<compile_context>
chip_gen: v7x
topology: tpu7x:2x2x1
jax: 0.10.0
libtpu: 0.0.40
codegen_flags: <defaults>
</compile_context>

<pallas_src>
import functools

import jax
import jax.numpy as jnp
from jax.experimental import pallas as pl
from jax.experimental.pallas import tpu as pltpu


def _round_up(v, m):
    return (v + m - 1) // m * m


def fused_graphsage_kernel(a_ref, xk_ref, xr_ref, ws1_ref, wn1_ref,
                           ws2_ref, wn2_ref, b1_ref, b2_ref,
                           o_ref, h1_ref, acc1_ref, acc2_ref, *, tm, tk):
    """Fused 2-layer SAGEConv.

    grid = (phase, row_tile, k_tile):
      phase 0: acc1 += A[r, k] @ x[k];  at k == last:
               h1[r] = relu(x[r] @ W_self1 + acc1.bf16 @ W_neigh1 + b1)
               (h1 lives in a VMEM scratch, never round-trips through HBM)
      phase 1: acc2 += A[r, k] @ h1[k]; at k == last:
               out[r] = h1[r] @ W_self2 + acc2.bf16 @ W_neigh2 + b2
    Phase is the outermost (slowest) grid axis, so h1 is fully populated before
    any phase-1 read; all axes are 'arbitrary' (sequential, single core).
    """
    phase = pl.program_id(0)
    r = pl.program_id(1)
    k = pl.program_id(2)
    nk = pl.num_programs(2)
    row0 = pl.multiple_of(r * tm, tm)
    col0 = pl.multiple_of(k * tk, tk)

    a_tile = a_ref[...]                                    # (tm, tk) bf16

    @pl.when(phase == 0)
    def _layer1():
        @pl.when(k == 0)
        def _():
            acc1_ref[...] = jnp.zeros_like(acc1_ref)

        acc1_ref[...] += jnp.dot(a_tile, xk_ref[...],
                                 preferred_element_type=jnp.float32)

        @pl.when(k == nk - 1)
        def _project():
            h_neigh = acc1_ref[...].astype(jnp.bfloat16)   # (tm, Din_pad)
            h1 = (jnp.dot(xr_ref[...], ws1_ref[...],
                          preferred_element_type=jnp.float32)
                  + jnp.dot(h_neigh, wn1_ref[...],
                            preferred_element_type=jnp.float32)
                  + b1_ref[...])
            h1 = jnp.maximum(h1, 0.0)                      # ReLU (f32 epilogue)
            h1_ref[pl.ds(row0, tm), :] = h1.astype(jnp.bfloat16)

    @pl.when(phase == 1)
    def _layer2():
        @pl.when(k == 0)
        def _():
            acc2_ref[...] = jnp.zeros_like(acc2_ref)

        acc2_ref[...] += jnp.dot(a_tile, h1_ref[pl.ds(col0, tk), :],
                                 preferred_element_type=jnp.float32)

        @pl.when(k == nk - 1)
        def _project():
            h_neigh = acc2_ref[...].astype(jnp.bfloat16)   # (tm, H_pad)
            h1_tile = h1_ref[pl.ds(row0, tm), :]           # (tm, H_pad) bf16
            out = (jnp.dot(h1_tile, ws2_ref[...],
                           preferred_element_type=jnp.float32)
                   + jnp.dot(h_neigh, wn2_ref[...],
                             preferred_element_type=jnp.float32)
                   + b2_ref[...])
            o_ref[...] = out.astype(o_ref.dtype)


def graphsage_forward(a_norm, x, params):
    """2-layer GraphSAGE forward (conv1 -> relu -> conv2) as one fused kernel."""
    n, in_feats = x.shape
    h_feats = params["w_self1"].shape[1]

    # --- padding / tiling (lane-dense: multiples of 128) -------------------
    din_pad = _round_up(in_feats, 128)
    h_pad = _round_up(h_feats, 128)
    n_pad = _round_up(n, 128)
    # 256 fills the 256x256 MXU on v6e/v7x and halves grid-step overhead;
    # tiny graphs just use a single tile.
    tm = 256 if n_pad >= 256 else n_pad
    tk = tm
    n_pad = _round_up(n_pad, tm)
    num_row_tiles = n_pad // tm
    num_k_tiles = n_pad // tk

    def pad2(arr, rows, cols):
        return jnp.pad(arr, ((0, rows - arr.shape[0]), (0, cols - arr.shape[1])))

    # Dominant operand + activations in bf16, f32 accumulation in-kernel.
    a_p = pad2(a_norm, n_pad, n_pad).astype(jnp.bfloat16)
    x_p = pad2(x, n_pad, din_pad).astype(jnp.bfloat16)

    ws1 = pad2(params["w_self1"], din_pad, h_pad).astype(jnp.bfloat16)
    wn1 = pad2(params["w_neigh1"], din_pad, h_pad).astype(jnp.bfloat16)
    ws2 = pad2(params["w_self2"], h_pad, h_pad).astype(jnp.bfloat16)
    wn2 = pad2(params["w_neigh2"], h_pad, h_pad).astype(jnp.bfloat16)
    b1 = pad2(params["b_self1"] + params["b_neigh1"], 1, h_pad).astype(jnp.float32)
    b2 = pad2(params["b_self2"] + params["b_neigh2"], 1, h_pad).astype(jnp.float32)

    # --- VMEM budget (64 MiB on v7x, 128 MiB on v5e/v6e) --------------------
    try:
        info = pltpu.get_tpu_info()
        vmem_cap = getattr(info, "vmem_capacity_bytes", 64 * 1024 * 1024)
    except Exception:  # pragma: no cover - conservative fallback
        vmem_cap = 64 * 1024 * 1024
    vmem_limit = int(vmem_cap) * 3 // 4        # leave headroom for compiler scratch

    # --- cost estimate ------------------------------------------------------
    flops = (2 * n_pad * n_pad * din_pad            # layer-1 aggregation
             + 2 * 2 * n_pad * din_pad * h_pad      # layer-1 projections (2 dots)
             + 2 * n_pad * n_pad * h_pad            # layer-2 aggregation
             + 2 * 2 * n_pad * h_pad * h_pad)       # layer-2 projections (2 dots)
    bytes_accessed = (2 * n_pad * n_pad * 2         # A streamed once per phase
                      + 2 * n_pad * din_pad * 2     # x: k-stream + self row tiles
                      + (2 * din_pad * h_pad + 2 * h_pad * h_pad) * 2   # weights
                      + 2 * h_pad * 4               # biases
                      + n_pad * h_pad * 4)          # output written once
    cost = pl.CostEstimate(flops=flops, transcendentals=0,
                           bytes_accessed=bytes_accessed)

    kernel = functools.partial(fused_graphsage_kernel, tm=tm, tk=tk)

    out_p = pl.pallas_call(
        kernel,
        out_shape=jax.ShapeDtypeStruct((n_pad, h_pad), jnp.float32),
        grid_spec=pltpu.PrefetchScalarGridSpec(
            num_scalar_prefetch=0,
            grid=(2, num_row_tiles, num_k_tiles),        # (phase, row, contraction)
            in_specs=[
                # A tile: streams (tm, tk) blocks in both phases.
                pl.BlockSpec((tm, tk), lambda p, r, k: (r, k)),
                # x k-stream for aggregation; frozen to block 0 during phase 1
                # (unused there) so it is not re-fetched.
                pl.BlockSpec((tk, din_pad), lambda p, r, k: (k * (1 - p), 0)),
                # x self rows for the layer-1 self projection (constant over k).
                pl.BlockSpec((tm, din_pad), lambda p, r, k: (r, 0)),
                pl.BlockSpec((din_pad, h_pad), lambda p, r, k: (0, 0)),  # W_self1
                pl.BlockSpec((din_pad, h_pad), lambda p, r, k: (0, 0)),  # W_neigh1
                pl.BlockSpec((h_pad, h_pad), lambda p, r, k: (0, 0)),    # W_self2
                pl.BlockSpec((h_pad, h_pad), lambda p, r, k: (0, 0)),    # W_neigh2
                pl.BlockSpec((1, h_pad), lambda p, r, k: (0, 0)),        # b1 (pre-summed)
                pl.BlockSpec((1, h_pad), lambda p, r, k: (0, 0)),        # b2 (pre-summed)
            ],
            # r*p collapses all of phase 0 onto block (0, 0): no stale output
            # block is ever flushed; each row tile is written back exactly once
            # (by phase 1), which fully overwrites it.
            out_specs=pl.BlockSpec((tm, h_pad), lambda p, r, k: (r * p, 0)),
            scratch_shapes=[
                pltpu.VMEM((n_pad, h_pad), jnp.bfloat16),   # h1 (layer-1 output)
                pltpu.VMEM((tm, din_pad), jnp.float32),     # layer-1 agg accumulator
                pltpu.VMEM((tm, h_pad), jnp.float32),       # layer-2 agg accumulator
            ],
        ),
        compiler_params=pltpu.CompilerParams(
            # Phase 1 reads the full h1 scratch written in phase 0 and the
            # k-axis accumulates, so all grid axes stay sequential on one core.
            dimension_semantics=("arbitrary", "arbitrary", "arbitrary"),
            vmem_limit_bytes=vmem_limit,
        ),
        cost_estimate=cost,
    )(a_p, x_p, x_p, ws1, wn1, ws2, wn2, b1, b2)

    return out_p[:n, :h_feats]


def build_graph(num_nodes, key):
    """Deterministic small directed graph -> row-normalized dense adjacency."""
    adj = jnp.zeros((num_nodes, num_nodes), jnp.float32)
    src = jnp.arange(num_nodes)
    dst = (src + 1) % num_nodes
    adj = adj.at[dst, src].set(1.0)
    extra_src = jax.random.randint(key, (num_nodes,), 0, num_nodes)
    extra_dst = (extra_src * 7 + 3) % num_nodes
    adj = adj.at[extra_dst, extra_src].set(1.0)
    deg = jnp.sum(adj, axis=1, keepdims=True)               # in-degree per node
    a_norm = jnp.where(deg > 0, adj / jnp.maximum(deg, 1.0), 0.0)
    return a_norm.astype(jnp.float32)


def init_params(in_feats, h_feats, key):
    ks = jax.random.split(key, 8)
    scale1 = 1.0 / jnp.sqrt(in_feats)
    scale2 = 1.0 / jnp.sqrt(h_feats)
    return {
        "w_self1":  jax.random.normal(ks[0], (in_feats, h_feats), jnp.float32) * scale1,
        "w_neigh1": jax.random.normal(ks[1], (in_feats, h_feats), jnp.float32) * scale1,
        "b_self1":  jax.random.normal(ks[2], (1, h_feats), jnp.float32) * 0.01,
        "b_neigh1": jax.random.normal(ks[3], (1, h_feats), jnp.float32) * 0.01,
        "w_self2":  jax.random.normal(ks[4], (h_feats, h_feats), jnp.float32) * scale2,
        "w_neigh2": jax.random.normal(ks[5], (h_feats, h_feats), jnp.float32) * scale2,
        "b_self2":  jax.random.normal(ks[6], (1, h_feats), jnp.float32) * 0.01,
        "b_neigh2": jax.random.normal(ks[7], (1, h_feats), jnp.float32) * 0.01,
    }


def reference_forward(a_norm, x, params):
    """Pure-JAX reference mirroring the kernel's bf16 operand quantization.

    Note: h_neigh and h1 are quantized to bf16 between layers (matching the
    kernel); expect ~1e-2 level divergence from a pure-f32 DGL SAGEConv.
    """
    f32 = jnp.float32
    bf = lambda t: t.astype(jnp.bfloat16)
    a_b, x_b = bf(a_norm), bf(x)
    ws1, wn1 = bf(params["w_self1"]), bf(params["w_neigh1"])
    ws2, wn2 = bf(params["w_self2"]), bf(params["w_neigh2"])
    b1 = (params["b_self1"] + params["b_neigh1"]).astype(f32)
    b2 = (params["b_self2"] + params["b_neigh2"]).astype(f32)

    hn1 = bf(jnp.dot(a_b, x_b, preferred_element_type=f32))
    h1 = jnp.maximum(jnp.dot(x_b, ws1, preferred_element_type=f32)
                     + jnp.dot(hn1, wn1, preferred_element_type=f32) + b1, 0.0)
    h1 = bf(h1)
    hn2 = bf(jnp.dot(a_b, h1, preferred_element_type=f32))
    out = (jnp.dot(h1, ws2, preferred_element_type=f32)
           + jnp.dot(hn2, wn2, preferred_element_type=f32) + b2)
    return out


if __name__ == "__main__":
    N, IN_FEATS, H_FEATS = 64, 16, 32

    key = jax.random.PRNGKey(0)
    k_graph, k_feat, k_param = jax.random.split(key, 3)

    a_norm = build_graph(N, k_graph)                               # (N, N)
    x = jax.random.normal(k_feat, (N, IN_FEATS), jnp.float32)      # (N, in_feats)
    params = init_params(IN_FEATS, H_FEATS, k_param)

    out = graphsage_forward(a_norm, x, params)                     # (N, h_feats)
    out = jax.block_until_ready(out)

    ref = reference_forward(a_norm, x, params)
    assert out.shape == (N, H_FEATS)
    assert jnp.allclose(out, ref, atol=2e-2, rtol=2e-2), (
        float(jnp.max(jnp.abs(out - ref))))

    print("KERNEL_OK")
</pallas_src>

<mosaic_0001>
module attributes {stable_mosaic.version = 11 : i64} {
  func.func @fused_graphsage_kernel(%arg0: i32, %arg1: i32, %arg2: i32, %arg3: memref<128x128xbf16, #tpu.memory_space<vmem>>, %arg4: memref<128x128xbf16, #tpu.memory_space<vmem>>, %arg5: memref<128x128xbf16, #tpu.memory_space<vmem>>, %arg6: memref<128x128xbf16, #tpu.memory_space<vmem>>, %arg7: memref<128x128xbf16, #tpu.memory_space<vmem>>, %arg8: memref<128x128xbf16, #tpu.memory_space<vmem>>, %arg9: memref<128x128xbf16, #tpu.memory_space<vmem>>, %arg10: memref<1x128xf32, #tpu.memory_space<vmem>>, %arg11: memref<1x128xf32, #tpu.memory_space<vmem>>, %arg12: memref<128x128xf32, #tpu.memory_space<vmem>>, %arg13: memref<128x128xbf16, #tpu.memory_space<vmem>>, %arg14: memref<128x128xf32, #tpu.memory_space<vmem>>, %arg15: memref<128x128xf32, #tpu.memory_space<vmem>>) attributes {dimension_semantics = [#tpu.dimension_semantics<arbitrary>, #tpu.dimension_semantics<arbitrary>, #tpu.dimension_semantics<arbitrary>], iteration_bounds = array<i64: 2, 1, 1>, scalar_prefetch = 0 : i64, scratch_operands = 3 : i64, tpu.core_type = #tpu.core_type<tc>, window_params = [{transform_indices = @transform_0, window_bounds = array<i64: 128, 128>}, {transform_indices = @transform_1, window_bounds = array<i64: 128, 128>}, {transform_indices = @transform_2, window_bounds = array<i64: 128, 128>}, {pipeline_mode = #tpu.pipeline_mode<synchronous>, transform_indices = @transform_3, window_bounds = array<i64: 128, 128>}, {pipeline_mode = #tpu.pipeline_mode<synchronous>, transform_indices = @transform_4, window_bounds = array<i64: 128, 128>}, {pipeline_mode = #tpu.pipeline_mode<synchronous>, transform_indices = @transform_5, window_bounds = array<i64: 128, 128>}, {pipeline_mode = #tpu.pipeline_mode<synchronous>, transform_indices = @transform_6, window_bounds = array<i64: 128, 128>}, {pipeline_mode = #tpu.pipeline_mode<synchronous>, transform_indices = @transform_7, window_bounds = array<i64: 1, 128>}, {pipeline_mode = #tpu.pipeline_mode<synchronous>, transform_indices = @transform_8, window_bounds = array<i64: 1, 128>}, {transform_indices = @transform_9, window_bounds = array<i64: 128, 128>}]} {
    %c128_i32 = arith.constant 128 : i32
    %0 = arith.muli %arg1, %c128_i32 : i32
    %1 = tpu.assume_multiple %0, 128 : i32
    %c128_i32_0 = arith.constant 128 : i32
    %2 = arith.muli %arg2, %c128_i32_0 : i32
    %3 = tpu.assume_multiple %2, 128 : i32
    %c0 = arith.constant 0 : index
    %c0_1 = arith.constant 0 : index
    %4 = vector.load %arg3[%c0, %c0_1] : memref<128x128xbf16, #tpu.memory_space<vmem>>, vector<128x128xbf16>
    %c0_i32 = arith.constant 0 : i32
    %5 = arith.cmpi eq, %arg0, %c0_i32 : i32
    %6 = arith.extui %5 : i1 to i32
    %c0_i32_2 = arith.constant 0 : i32
    %7 = arith.cmpi ne, %6, %c0_i32_2 : i32
    scf.if %7 {
      %c0_i32_4 = arith.constant 0 : i32
      %11 = arith.cmpi eq, %arg2, %c0_i32_4 : i32
      %12 = arith.extui %11 : i1 to i32
      %c0_i32_5 = arith.constant 0 : i32
      %13 = arith.cmpi ne, %12, %c0_i32_5 : i32
      scf.if %13 {
        %cst_14 = arith.constant 0.000000e+00 : f32
        %22 = vector.broadcast %cst_14 : f32 to vector<128x128xf32>
        %c0_15 = arith.constant 0 : index
        %c0_16 = arith.constant 0 : index
        %23 = vector.load %arg14[%c0_15, %c0_16] : memref<128x128xf32, #tpu.memory_space<vmem>>, vector<128x128xf32>
        tpu.vector_store %arg14[%c0_15, %c0_16], %22 {strides = array<i32>} : memref<128x128xf32, #tpu.memory_space<vmem>>, vector<128x128xf32>,
      } else {
      }
      %c0_6 = arith.constant 0 : index
      %c0_7 = arith.constant 0 : index
      %14 = vector.load %arg14[%c0_6, %c0_7] : memref<128x128xf32, #tpu.memory_space<vmem>>, vector<128x128xf32>
      %c0_8 = arith.constant 0 : index
      %c0_9 = arith.constant 0 : index
      %15 = vector.load %arg4[%c0_8, %c0_9] : memref<128x128xbf16, #tpu.memory_space<vmem>>, vector<128x128xbf16>
      %cst = arith.constant dense<0.000000e+00> : vector<128x128xf32>
      %16 = tpu.matmul %4, %15, %cst {dimension_numbers = #tpu.dot_dimension_numbers<[1], [0], [0], [1], [0, 0, 1, 1], [], []>} : vector<128x128xbf16>, vector<128x128xbf16>, vector<128x128xf32> -> vector<128x128xf32>
      %17 = arith.addf %14, %16 : vector<128x128xf32>
      %c0_10 = arith.constant 0 : index
      %c0_11 = arith.constant 0 : index
      %18 = vector.load %arg14[%c0_10, %c0_11] : memref<128x128xf32, #tpu.memory_space<vmem>>, vector<128x128xf32>
      tpu.vector_store %arg14[%c0_10, %c0_11], %17 {strides = array<i32>} : memref<128x128xf32, #tpu.memory_space<vmem>>, vector<128x128xf32>,
      %c0_i32_12 = arith.constant 0 : i32
      %19 = arith.cmpi eq, %arg2, %c0_i32_12 : i32
      %20 = arith.extui %19 : i1 to i32
      %c0_i32_13 = arith.constant 0 : i32
      %21 = arith.cmpi ne, %20, %c0_i32_13 : i32
      scf.if %21 {
        %c0_14 = arith.constant 0 : index
        %c0_15 = arith.constant 0 : index
        %22 = vector.load %arg14[%c0_14, %c0_15] : memref<128x128xf32, #tpu.memory_space<vmem>>, vector<128x128xf32>
        %23 = arith.truncf %22 : vector<128x128xf32> to vector<128x128xbf16>
        %c0_16 = arith.constant 0 : index
        %c0_17 = arith.constant 0 : index
        %24 = vector.load %arg5[%c0_16, %c0_17] : memref<128x128xbf16, #tpu.memory_space<vmem>>, vector<128x128xbf16>
        %c0_18 = arith.constant 0 : index
        %c0_19 = arith.constant 0 : index
        %25 = vector.load %arg6[%c0_18, %c0_19] : memref<128x128xbf16, #tpu.memory_space<vmem>>, vector<128x128xbf16>
        %cst_20 = arith.constant dense<0.000000e+00> : vector<128x128xf32>
        %26 = tpu.matmul %24, %25, %cst_20 {dimension_numbers = #tpu.dot_dimension_numbers<[1], [0], [0], [1], [0, 0, 1, 1], [], []>} : vector<128x128xbf16>, vector<128x128xbf16>, vector<128x128xf32> -> vector<128x128xf32>
        %c0_21 = arith.constant 0 : index
        %c0_22 = arith.constant 0 : index
        %27 = vector.load %arg7[%c0_21, %c0_22] : memref<128x128xbf16, #tpu.memory_space<vmem>>, vector<128x128xbf16>
        %cst_23 = arith.constant dense<0.000000e+00> : vector<128x128xf32>
        %28 = tpu.matmul %23, %27, %cst_23 {dimension_numbers = #tpu.dot_dimension_numbers<[1], [0], [0], [1], [0, 0, 1, 1], [], []>} : vector<128x128xbf16>, vector<128x128xbf16>, vector<128x128xf32> -> vector<128x128xf32>
        %29 = arith.addf %26, %28 : vector<128x128xf32>
        %c0_24 = arith.constant 0 : index
        %c0_25 = arith.constant 0 : index
        %30 = vector.load %arg10[%c0_24, %c0_25] : memref<1x128xf32, #tpu.memory_space<vmem>>, vector<1x128xf32>
        %31 = vector.broadcast %30 : vector<1x128xf32> to vector<128x128xf32>
        %32 = arith.addf %29, %31 : vector<128x128xf32>
        %cst_26 = arith.constant 0.000000e+00 : f32
        %33 = vector.broadcast %cst_26 : f32 to vector<128x128xf32>
        %34 = arith.maximumf %32, %33 : vector<128x128xf32>
        %35 = arith.truncf %34 : vector<128x128xf32> to vector<128x128xbf16>
        %36 = arith.index_cast %1 : i32 to index
        %c0_27 = arith.constant 0 : index
        %37 = vector.load %arg13[%36, %c0_27] : memref<128x128xbf16, #tpu.memory_space<vmem>>, vector<128x128xbf16>
        tpu.vector_store %arg13[%36, %c0_27], %35 {strides = array<i32>} : memref<128x128xbf16, #tpu.memory_space<vmem>>, vector<128x128xbf16>,
      } else {
      }
    } else {
    }
    %c1_i32 = arith.constant 1 : i32
    %8 = arith.cmpi eq, %arg0, %c1_i32 : i32
    %9 = arith.extui %8 : i1 to i32
    %c0_i32_3 = arith.constant 0 : i32
    %10 = arith.cmpi ne, %9, %c0_i32_3 : i32
    scf.if %10 {
      %c0_i32_4 = arith.constant 0 : i32
      %11 = arith.cmpi eq, %arg2, %c0_i32_4 : i32
      %12 = arith.extui %11 : i1 to i32
      %c0_i32_5 = arith.constant 0 : i32
      %13 = arith.cmpi ne, %12, %c0_i32_5 : i32
      scf.if %13 {
        %cst_13 = arith.constant 0.000000e+00 : f32
        %23 = vector.broadcast %cst_13 : f32 to vector<128x128xf32>
        %c0_14 = arith.constant 0 : index
        %c0_15 = arith.constant 0 : index
        %24 = vector.load %arg15[%c0_14, %c0_15] : memref<128x128xf32, #tpu.memory_space<vmem>>, vector<128x128xf32>
        tpu.vector_store %arg15[%c0_14, %c0_15], %23 {strides = array<i32>} : memref<128x128xf32, #tpu.memory_space<vmem>>, vector<128x128xf32>,
      } else {
      }
      %c0_6 = arith.constant 0 : index
      %c0_7 = arith.constant 0 : index
      %14 = vector.load %arg15[%c0_6, %c0_7] : memref<128x128xf32, #tpu.memory_space<vmem>>, vector<128x128xf32>
      %15 = arith.index_cast %3 : i32 to index
      %c0_8 = arith.constant 0 : index
      %16 = vector.load %arg13[%15, %c0_8] : memref<128x128xbf16, #tpu.memory_space<vmem>>, vector<128x128xbf16>
      %cst = arith.constant dense<0.000000e+00> : vector<128x128xf32>
      %17 = tpu.matmul %4, %16, %cst {dimension_numbers = #tpu.dot_dimension_numbers<[1], [0], [0], [1], [0, 0, 1, 1], [], []>} : vector<128x128xbf16>, vector<128x128xbf16>, vector<128x128xf32> -> vector<128x128xf32>
      %18 = arith.addf %14, %17 : vector<128x128xf32>
      %c0_9 = arith.constant 0 : index
      %c0_10 = arith.constant 0 : index
      %19 = vector.load %arg15[%c0_9, %c0_10] : memref<128x128xf32, #tpu.memory_space<vmem>>, vector<128x128xf32>
      tpu.vector_store %arg15[%c0_9, %c0_10], %18 {strides = array<i32>} : memref<128x128xf32, #tpu.memory_space<vmem>>, vector<128x128xf32>,
      %c0_i32_11 = arith.constant 0 : i32
      %20 = arith.cmpi eq, %arg2, %c0_i32_11 : i32
      %21 = arith.extui %20 : i1 to i32
      %c0_i32_12 = arith.constant 0 : i32
      %22 = arith.cmpi ne, %21, %c0_i32_12 : i32
      scf.if %22 {
        %c0_13 = arith.constant 0 : index
        %c0_14 = arith.constant 0 : index
        %23 = vector.load %arg15[%c0_13, %c0_14] : memref<128x128xf32, #tpu.memory_space<vmem>>, vector<128x128xf32>
        %24 = arith.truncf %23 : vector<128x128xf32> to vector<128x128xbf16>
        %25 = arith.index_cast %1 : i32 to index
        %c0_15 = arith.constant 0 : index
        %26 = vector.load %arg13[%25, %c0_15] : memref<128x128xbf16, #tpu.memory_space<vmem>>, vector<128x128xbf16>
        %c0_16 = arith.constant 0 : index
        %c0_17 = arith.constant 0 : index
        %27 = vector.load %arg8[%c0_16, %c0_17] : memref<128x128xbf16, #tpu.memory_space<vmem>>, vector<128x128xbf16>
        %cst_18 = arith.constant dense<0.000000e+00> : vector<128x128xf32>
        %28 = tpu.matmul %26, %27, %cst_18 {dimension_numbers = #tpu.dot_dimension_numbers<[1], [0], [0], [1], [0, 0, 1, 1], [], []>} : vector<128x128xbf16>, vector<128x128xbf16>, vector<128x128xf32> -> vector<128x128xf32>
        %c0_19 = arith.constant 0 : index
        %c0_20 = arith.constant 0 : index
        %29 = vector.load %arg9[%c0_19, %c0_20] : memref<128x128xbf16, #tpu.memory_space<vmem>>, vector<128x128xbf16>
        %cst_21 = arith.constant dense<0.000000e+00> : vector<128x128xf32>
        %30 = tpu.matmul %24, %29, %cst_21 {dimension_numbers = #tpu.dot_dimension_numbers<[1], [0], [0], [1], [0, 0, 1, 1], [], []>} : vector<128x128xbf16>, vector<128x128xbf16>, vector<128x128xf32> -> vector<128x128xf32>
        %31 = arith.addf %28, %30 : vector<128x128xf32>
        %c0_22 = arith.constant 0 : index
        %c0_23 = arith.constant 0 : index
        %32 = vector.load %arg11[%c0_22, %c0_23] : memref<1x128xf32, #tpu.memory_space<vmem>>, vector<1x128xf32>
        %33 = vector.broadcast %32 : vector<1x128xf32> to vector<128x128xf32>
        %34 = arith.addf %31, %33 : vector<128x128xf32>
        %c0_24 = arith.constant 0 : index
        %c0_25 = arith.constant 0 : index
        %35 = vector.load %arg12[%c0_24, %c0_25] : memref<128x128xf32, #tpu.memory_space<vmem>>, vector<128x128xf32>
        tpu.vector_store %arg12[%c0_24, %c0_25], %34 {strides = array<i32>} : memref<128x128xf32, #tpu.memory_space<vmem>>, vector<128x128xf32>,
      } else {
      }
    } else {
    }
    return
  }
  func.func @transform_0(%arg0: i32, %arg1: i32, %arg2: i32) -> (i32, i32) {
    %c0_i32 = arith.constant 0 : i32
    return %arg1, %arg2 : i32, i32
  }
  func.func @transform_1(%arg0: i32, %arg1: i32, %arg2: i32) -> (i32, i32) {
    %c1_i32 = arith.constant 1 : i32
    %0 = arith.subi %c1_i32, %arg0 : i32
    %1 = arith.muli %arg2, %0 : i32
    %c0_i32 = arith.constant 0 : i32
    %c0_i32_0 = arith.constant 0 : i32
    return %1, %c0_i32 : i32, i32
  }
  func.func @transform_2(%arg0: i32, %arg1: i32, %arg2: i32) -> (i32, i32) {
    %c0_i32 = arith.constant 0 : i32
    %c0_i32_0 = arith.constant 0 : i32
    return %arg1, %c0_i32 : i32, i32
  }
  func.func @transform_3(%arg0: i32, %arg1: i32, %arg2: i32) -> (i32, i32) {
    %c0_i32 = arith.constant 0 : i32
    %c0_i32_0 = arith.constant 0 : i32
    %c0_i32_1 = arith.constant 0 : i32
    return %c0_i32, %c0_i32_0 : i32, i32
  }
  func.func @transform_4(%arg0: i32, %arg1: i32, %arg2: i32) -> (i32, i32) {
    %c0_i32 = arith.constant 0 : i32
    %c0_i32_0 = arith.constant 0 : i32
    %c0_i32_1 = arith.constant 0 : i32
    return %c0_i32, %c0_i32_0 : i32, i32
  }
  func.func @transform_5(%arg0: i32, %arg1: i32, %arg2: i32) -> (i32, i32) {
    %c0_i32 = arith.constant 0 : i32
    %c0_i32_0 = arith.constant 0 : i32
    %c0_i32_1 = arith.constant 0 : i32
    return %c0_i32, %c0_i32_0 : i32, i32
  }
  func.func @transform_6(%arg0: i32, %arg1: i32, %arg2: i32) -> (i32, i32) {
    %c0_i32 = arith.constant 0 : i32
    %c0_i32_0 = arith.constant 0 : i32
    %c0_i32_1 = arith.constant 0 : i32
    return %c0_i32, %c0_i32_0 : i32, i32
  }
  func.func @transform_7(%arg0: i32, %arg1: i32, %arg2: i32) -> (i32, i32) {
    %c0_i32 = arith.constant 0 : i32
    %c0_i32_0 = arith.constant 0 : i32
    %c0_i32_1 = arith.constant 0 : i32
    return %c0_i32, %c0_i32_0 : i32, i32
  }
  func.func @transform_8(%arg0: i32, %arg1: i32, %arg2: i32) -> (i32, i32) {
    %c0_i32 = arith.constant 0 : i32
    %c0_i32_0 = arith.constant 0 : i32
    %c0_i32_1 = arith.constant 0 : i32
    return %c0_i32, %c0_i32_0 : i32, i32
  }
  func.func @transform_9(%arg0: i32, %arg1: i32, %arg2: i32) -> (i32, i32) {
    %0 = arith.muli %arg1, %arg0 : i32
    %c0_i32 = arith.constant 0 : i32
    %c0_i32_0 = arith.constant 0 : i32
    return %0, %c0_i32 : i32, i32
  }
}

</mosaic_0001>

<bundles_post_ra>
// kernel: tpu_custom_call.1
= control target key start
LH: loop header
LB: loop body
LE: loop exit
PB: predicated region body
PF: predicated region fallthrough
CT: control target
= control target key end

     0   :  { %s3439_s0 = inlined_call_operand.hbm [shape: bf16[128,128], index: 0, kind: input, shape index: {}]   ;;  %s3440_s1 = inlined_call_operand.hbm [shape: bf16[128,128], index: 1, kind: input, shape index: {}]   ;;  %s3441_s2 = inlined_call_operand.hbm [shape: bf16[128,128], index: 2, kind: input, shape index: {}]   ;;  %s3442_s3 = inlined_call_operand.hbm [shape: bf16[128,128], index: 3, kind: input, shape index: {}]   ;;  %s3443_s4 = inlined_call_operand.hbm [shape: bf16[128,128], index: 4, kind: input, shape index: {}]   ;;  %s3444_s5 = inlined_call_operand.hbm [shape: bf16[128,128], index: 5, kind: input, shape index: {}]   ;;  %s3445_s6 = inlined_call_operand.hbm [shape: bf16[128,128], index: 6, kind: input, shape index: {}]   ;;  %s3446_s7 = inlined_call_operand.vmem [shape: f32[1,128], index: 7, kind: input, shape index: {}]   ;;  %s3447_s8 = inlined_call_operand.vmem [shape: f32[1,128], index: 8, kind: input, shape index: {}]   ;;  %s3448_s9 = inlined_call_operand.hbm [shape: f32[128,128], index: 9, kind: output, shape index: {}]  }
   0x1   :  { %3451 = sst [smem:[#allocation24_spill]] %s3441_s2 }
   0x2   :  { %3452 = sst [smem:[#allocation25_spill]] %s3442_s3 }
   0x3   :  { %14 = vsyncpa [#allocation6], 0 }
   0x4   :  { %15 = vsyncpa [#allocation9], 0 }
   0x5   :  { %17 = vsyncpa [#allocation9 + $0x1], 0 }
   0x6   :  { %18 = vsyncpa [#allocation12], 0 }
   0x7   :  { %19 = vsyncpa [#allocation15], 0 }
   0x8   :  { %20 = vsyncpa [#allocation7], 0 }
   0x9   :  { %22 = vsyncpa [#allocation7 + $0x1], 0  ;;  %s2998_s30 = smov 0   ;;  %s3000_s10 = smov 0  }
   0xa   :  { %s3002_s11 = smov 0  }
   0xb LB: > { %s3014_s12 = sadd.s32 4294967295, %s2934_s11   ;;  %p2064_p0 = scmp.ge.s32.totalorder %s2934_s11, 1  ;;  %s2934_s11 = sphi %s3002_s11, %s28_s11   ;;  %s2930_s10 = sphi %s3000_s10, %s3475_s10   ;;  %s2926_s30 = sphi %s2998_s30, %s3474_s30  }
   0xc   : > { %p290_p1 = scmp.lt.s32.totalorder %s2934_s11, 3  ;;  %p3449_p2 = scmp.eq.s32.totalorder %s3014_s12, 0 }
   0xd   : > { %s2936_s15 = smov [#allocation10]   ;;  %s2937_s18 = smov [#allocation11]  }
   0xe   : > { %p3020_p3 = pnand %p2064_p0, %p290_p1  ;;  %s322_s16 = sshll.u32 %s2936_s15, 4  ;;  %s3027_s16 = int_to_ptr.vmem [resolvable:$true] %s322_s16 }
   0xf   : > { %s335_s19 = sshll.u32 %s2937_s18, 4  ;;  %s2938_s20 = smov [#allocation14]   ;;  %s3035_s19 = int_to_ptr.vmem [resolvable:$true] %s335_s19 }
  0x10   : > { %s3453_s14 = scalar_select %p3020_p3, 1, 0 }
  0x11   : > { %p2537_p5 = pneg %p3020_p3  ;;  %s3037_s21 = sshll.u32 %s2938_s20, 4  ;;  %s362_s21 = int_to_ptr.vmem [resolvable:$true] %s3037_s21 }
  0x12   : > { %s3455_s2 = sld [smem:[#allocation24_spill]] }
  0x13   : > { %p3031_p6 = pnand %p3449_p2, %p2537_p5 }
  0x15   : > { %p3047_p8 = pneg %p3031_p6 }
  0x18   : > { %s2666_s24 = scalar_lea.hbm %s3455_s2, 1024 }
  0x19   : > { %p2667_p7 = scmp.ne.s32.totalorder %s3455_s2, %s2666_s24  ;;  %p2673_p11 = scmp.lt.u32.totalorder %s2666_s24, %s3455_s2 }
  0x1b   : > { %p2669_p9 = pnand %p3047_p8, %p2667_p7 }
  0x1d   : > { %p2670_p10 = pneg %p2669_p9 }
  0x1f   : > { %p2675_p12 = pnand %p2673_p11, %p2670_p10 }
  0x21   : > { %2678 = shalt.err (!%p2675_p12)
}
  0x22   : > { %s2679_s15 = scalar_lea.vmem %s3027_s16, 1024  ;;  %p2687_p5 = scmp.lt.s32.totalorder %s3027_s16, %s3027_s16 }
  0x23   : > { %p2680_p13 = scmp.ne.s32.totalorder %s3027_s16, %s2679_s15  ;;  %p2688_p4 = scmp.lt.s32.totalorder %s2679_s15, %s2679_s15 }
  0x25   : > { %p2682_p0 = pnand %p2680_p13, %p3047_p8  ;;  %p2689_p7 = por %p2688_p4, %p2687_p5 }
  0x27   : > { %p2683_p1 = pneg %p2682_p0 }
  0x29   : > { %p2690_p9 = pnand %p2689_p7, %p2683_p1 }
  0x2b   : > { %2693 = shalt.err (!%p2690_p9)
}
  0x2c   : > { %s2939_s18 = smov 64   ;;  %s2940_s20 = smov 4  }
  0x2d   : > { %2543 = dma.hbm_to_vmem [thread:$0]  (!%p3031_p6), %s3455_s2, 1024, %s3027_s16, [#allocation9], %s2939_s18, %s2939_s18, %s2940_s20  }
  0x2e   : > { %s3457_s3 = sld [smem:[#allocation25_spill]] }
  0x34   : > { %s2694_s26 = scalar_lea.hbm %s3457_s3, 1024 }
  0x35   : > { %p2695_p4 = scmp.ne.s32.totalorder %s3457_s3, %s2694_s26  ;;  %p2701_p12 = scmp.lt.u32.totalorder %s2694_s26, %s3457_s3 }
  0x37   : > { %p2697_p10 = pnand %p2695_p4, %p3047_p8 }
  0x39   : > { %p2698_p11 = pneg %p2697_p10 }
  0x3b   : > { %p2703_p13 = pnand %p2701_p12, %p2698_p11 }
  0x3d   : > { %2706 = shalt.err (!%p2703_p13)
}
  0x3e   : > { %s2707_s16 = scalar_lea.vmem %s3035_s19, 1024  ;;  %p2715_p7 = scmp.lt.s32.totalorder %s3035_s19, %s3035_s19 }
  0x3f   : > { %p2708_p0 = scmp.ne.s32.totalorder %s3035_s19, %s2707_s16  ;;  %p2716_p9 = scmp.lt.s32.totalorder %s2707_s16, %s2707_s16 }
  0x41   : > { %p2710_p1 = pnand %p2708_p0, %p3047_p8  ;;  %p2717_p4 = por %p2716_p9, %p2715_p7 }
  0x43   : > { %p2711_p5 = pneg %p2710_p1 }
  0x45   : > { %p2718_p10 = pnand %p2717_p4, %p2711_p5 }
  0x47   : > { %2721 = shalt.err (!%p2718_p10)
}
  0x48   : > { %2546 = dma.hbm_to_vmem [thread:$0]  (!%p3031_p6), %s3457_s3, 1024, %s3035_s19, [#allocation12], %s2939_s18, %s2939_s18, %s2940_s20  }
  0x49   : > { %s2722_s25 = scalar_lea.hbm %s3444_s5, 1024 }
  0x4a   : > { %p2723_p11 = scmp.ne.s32.totalorder %s3444_s5, %s2722_s25  ;;  %p2729_p0 = scmp.lt.u32.totalorder %s2722_s25, %s3444_s5 }
  0x4c   : > { %p2725_p12 = pnand %p2723_p11, %p3047_p8 }
  0x4e   : > { %p2726_p13 = pneg %p2725_p12 }
  0x50   : > { %p2731_p1 = pnand %p2729_p0, %p2726_p13 }
  0x52   : > { %2734 = shalt.err (!%p2731_p1)
}
  0x53   : > { %s2735_s16 = scalar_lea.vmem %s362_s21, 1024  ;;  %p2743_p4 = scmp.lt.s32.totalorder %s362_s21, %s362_s21 }
  0x54   : > { %p2736_p5 = scmp.ne.s32.totalorder %s362_s21, %s2735_s16  ;;  %p2744_p10 = scmp.lt.s32.totalorder %s2735_s16, %s2735_s16 }
  0x56   : > { %p2738_p7 = pnand %p2736_p5, %p3047_p8  ;;  %p2745_p2 = por %p2744_p10, %p2743_p4 }
  0x58   : > { %p2739_p9 = pneg %p2738_p7 }
  0x5a   : > { %p2746_p3 = pnand %p2745_p2, %p2739_p9 }
  0x5c   : > { %2749 = shalt.err (!%p2746_p3)
}
  0x5d   : > { %2552 = dma.hbm_to_vmem [thread:$0]  (!%p3031_p6), %s3444_s5, 1024, %s362_s21, [#allocation15], %s2939_s18, %s2939_s18, %s2940_s20  }
  0x5e   : > { %s47_s22 = sadd.s32 1, %s2930_s10  ;;  %s2941_s23 = smov [#allocation5]  }
  0x5f   : > { %s306_s24 = sshll.u32 %s2941_s23, 4  ;;  %p3120_p11 = scmp.ge.s32.totalorder %s47_s22, 2  ;;  %s307_s24 = int_to_ptr.vmem [resolvable:$true] %s306_s24 }
  0x60   : > { %s2750_s29 = scalar_lea.hbm %s3439_s0, 1024 }
  0x61   : > { %s3458_s25 = scalar_select %p3120_p11, 1, 0 }
  0x62   : > { %p2751_p2 = scmp.ne.s32.totalorder %s3439_s0, %s2750_s29  ;;  %p2757_p13 = scmp.lt.u32.totalorder %s2750_s29, %s3439_s0 }
  0x64   : > { %p2753_p3 = pnand %p2751_p2, %p3047_p8 }
  0x66   : > { %p2754_p12 = pneg %p2753_p3 }
  0x68   : > { %p2759_p0 = pnand %p2757_p13, %p2754_p12 }
  0x6a   : > { %2762 = shalt.err (!%p2759_p0)
}
  0x6b   : > { %s2763_s13 = scalar_lea.vmem %s307_s24, 1024  ;;  %p2771_p9 = scmp.lt.s32.totalorder %s307_s24, %s307_s24 }
  0x6c   : > { %p2764_p1 = scmp.ne.s32.totalorder %s307_s24, %s2763_s13  ;;  %p2772_p4 = scmp.lt.s32.totalorder %s2763_s13, %s2763_s13 }
  0x6e   : > { %p2766_p5 = pnand %p2764_p1, %p3047_p8  ;;  %p2773_p10 = por %p2772_p4, %p2771_p9 }
  0x70   : > { %p2767_p7 = pneg %p2766_p5 }
  0x72   : > { %p2774_p11 = pnand %p2773_p10, %p2767_p7 }
  0x74   : > { %2777 = shalt.err (!%p2774_p11)
}
  0x75   : > { %2540 = dma.hbm_to_vmem [thread:$0]  (!%p3031_p6), %s3439_s0, 1024, %s307_s24, [#allocation6], %s2939_s18, %s2939_s18, %s2940_s20  }
  0x76   : > { %p3459_p2 = scmp.ne.s32.totalorder %s3458_s25, 0  ;;  %s2942_s28 = smov [#allocation13]  }
  0x77   : > { %s348_s29 = sshll.u32 %s2942_s28, 4  ;;  %s2943_s15 = smov [#allocation16]   ;;  %s349_s29 = int_to_ptr.vmem [resolvable:$true] %s348_s29 }
  0x78   : > { %s3477_s22 = smov (%p3459_p2, %s47_s22), 0  ;;  %s374_s16 = sshll.u32 %s2943_s15, 4  ;;  %s3149_s16 = int_to_ptr.vmem [resolvable:$true] %s374_s16 }
  0x79   : > { %s2778_s13 = scalar_lea.hbm %s3443_s4, 1024 }
  0x7a   : > { %p2779_p11 = scmp.ne.s32.totalorder %s3443_s4, %s2778_s13  ;;  %p2785_p13 = scmp.lt.u32.totalorder %s2778_s13, %s3443_s4 }
  0x7c   : > { %p2781_p3 = pnand %p2779_p11, %p3047_p8 }
  0x7e   : > { %p2782_p12 = pneg %p2781_p3 }
  0x80   : > { %p2787_p0 = pnand %p2785_p13, %p2782_p12 }
  0x82   : > { %2790 = shalt.err (!%p2787_p0)
}
  0x83   : > { %s2791_s23 = scalar_lea.vmem %s349_s29, 1024  ;;  %p2799_p9 = scmp.lt.s32.totalorder %s349_s29, %s349_s29 }
  0x84   : > { %p2792_p1 = scmp.ne.s32.totalorder %s349_s29, %s2791_s23  ;;  %p2800_p4 = scmp.lt.s32.totalorder %s2791_s23, %s2791_s23 }
  0x86   : > { %p2794_p5 = pnand %p2792_p1, %p3047_p8  ;;  %p2801_p10 = por %p2800_p4, %p2799_p9 }
  0x88   : > { %p2795_p7 = pneg %p2794_p5 }
  0x8a   : > { %p2802_p2 = pnand %p2801_p10, %p2795_p7 }
  0x8c   : > { %2805 = shalt.err (!%p2802_p2)
}
  0x8d   : > { %2549 = dma.hbm_to_vmem [thread:$0]  (!%p3031_p6), %s3443_s4, 1024, %s349_s29, [#allocation12], %s2939_s18, %s2939_s18, %s2940_s20  }
  0x8e   : > { %s2806_s15 = scalar_lea.hbm %s3445_s6, 1024 }
  0x8f   : > { %p2807_p11 = scmp.ne.s32.totalorder %s3445_s6, %s2806_s15  ;;  %p2813_p13 = scmp.lt.u32.totalorder %s2806_s15, %s3445_s6 }
  0x91   : > { %p2809_p3 = pnand %p2807_p11, %p3047_p8 }
  0x93   : > { %p2810_p12 = pneg %p2809_p3 }
  0x95   : > { %p2815_p0 = pnand %p2813_p13, %p2810_p12 }
  0x97   : > { %2818 = shalt.err (!%p2815_p0)
}
  0x98   : > { %s2819_s29 = scalar_lea.vmem %s3149_s16, 1024  ;;  %p2827_p9 = scmp.lt.s32.totalorder %s3149_s16, %s3149_s16 }
  0x99   : > { %p2820_p1 = scmp.ne.s32.totalorder %s3149_s16, %s2819_s29  ;;  %p2828_p4 = scmp.lt.s32.totalorder %s2819_s29, %s2819_s29 }
  0x9b   : > { %p2822_p5 = pnand %p2820_p1, %p3047_p8  ;;  %p2829_p10 = por %p2828_p4, %p2827_p9 }
  0x9d   : > { %p2823_p7 = pneg %p2822_p5 }
  0x9f   : > { %p2830_p2 = pnand %p2829_p10, %p2823_p7 }
  0xa1   : > { %2833 = shalt.err (!%p2830_p2)
}
  0xa2   : > { %2555 = dma.hbm_to_vmem [thread:$0]  (!%p3031_p6), %s3445_s6, 1024, %s3149_s16, [#allocation15], %s2939_s18, %s2939_s18, %s2940_s20  }
  0xa3   : > { %p2570_p8 = scmp.lt.s32.totalorder %s2934_s11, 2  ;;  %p2571_p11 = scmp.eq.s32.totalorder %s2934_s11, 0 }
  0xa4   : > { %s394_s27 = sand.u32 1, %s2934_s11   ;;  %s2944_s2 = smov [#allocation8]  }
  0xa5   : > { %s407_s3 = sshll.u32 %s2944_s2, 4  ;;  %p3201_p3 = pnand %p2571_p11, %p2570_p8  ;;  %s408_s3 = int_to_ptr.vmem [resolvable:$true] %s407_s3 }
  0xa6   : > { %s395_s17 = scalar_lea.sflag [#allocation9], %s394_s27  ;;  %s2834_s21 = scalar_lea.hbm %s3440_s1, 1024 }
  0xa7   : > { %p2835_p6 = scmp.ne.s32.totalorder %s3440_s1, %s2834_s21  ;;  %p2836_p12 = pneg %p3201_p3 }
  0xa8   : > { %p2841_p1 = scmp.lt.u32.totalorder %s2834_s21, %s3440_s1 }
  0xa9   : > { %p2837_p13 = pnand %p2836_p12, %p2835_p6 }
  0xab   : > { %p2838_p0 = pneg %p2837_p13 }
  0xad   : > { %p2843_p5 = pnand %p2841_p1, %p2838_p0 }
  0xaf   : > { %2846 = shalt.err (!%p2843_p5)
}
  0xb0   : > { %s2847_s29 = scalar_lea.vmem %s408_s3, 1024  ;;  %s2854_s25 = scalar_lea.vmem %s408_s3, 2048 }
  0xb1   : > { %p2848_p7 = scmp.ne.s32.totalorder %s408_s3, %s2847_s29  ;;  %p2855_p10 = scmp.lt.s32.totalorder %s408_s3, %s408_s3 }
  0xb2   : > { %p2856_p2 = scmp.lt.s32.totalorder %s2854_s25, %s2847_s29 }
  0xb3   : > { %p2850_p9 = pnand %p2848_p7, %p2836_p12 }
  0xb4   : > { %p2857_p8 = por %p2856_p2, %p2855_p10 }
  0xb5   : > { %p2851_p4 = pneg %p2850_p9 }
  0xb7   : > { %p2858_p11 = pnand %p2857_p8, %p2851_p4 }
  0xb9   : > { %2861 = shalt.err (!%p2858_p11)
}
  0xba   : > { %2559 = dma.hbm_to_vmem [thread:$0]  (!%p3201_p3), %s3440_s1, 1024, %s408_s3, %s395_s17, %s2939_s18, %s2939_s18, %s2940_s20  }
  0xbb   : > { %p3461_p6 = scmp.ne.s32.totalorder %s3453_s14, 0 }
  0xbc   : > { %p3462_p12 = scmp.eq.s32.totalorder (!%p3461_p6), %s3014_s12, 0 }
  0xbd   : > { %419 = sbr.rel (%p3461_p6) target bundleno = 1262 (0x4ee), region = 56 }
  0xc4   : > { %2901 = dma.done.wait (%p3462_p12), [#allocation6], 1024   ;;  %p3463_p13 = pmov %p3462_p12 }
  0xc5   : > { %s425_s2 = sand.u32 1, %s3014_s12   ;;  %p3464_p0 = pmov %p3462_p12 }
  0xc6   : > { %2903 = vsyncadd (%p3463_p13), [#allocation6], 4294966272  ;;  %s426_s26 = scalar_lea.sflag [#allocation9], %s425_s2 }
  0xc7   : > { %2905 = dma.done.wait (%p3464_p0), %s426_s26, 1024   ;;  %p3465_p1 = pmov %p3464_p0 }
  0xc8   : > { %p3466_p3 = pmov %p3464_p0 }
  0xc9   : > { %2907 = vsyncadd (%p3465_p1), %s426_s26, 4294966272 }
  0xca   : > { %2909 = dma.done.wait (%p3466_p3), [#allocation9], 1024   ;;  %p3467_p5 = pmov %p3464_p0 }
  0xcb   : > { %p3468_p7 = pmov %p3464_p0 }
  0xcc   : > { %2911 = vsyncadd (%p3467_p5), [#allocation9], 4294966272 }
  0xcd   : > { %2913 = dma.done.wait (%p3468_p7), [#allocation12], 2048   ;;  %p3469_p9 = pmov %p3464_p0 }
  0xce   : > { %p3470_p4 = pmov %p3464_p0 }
  0xcf   : > { %2915 = vsyncadd (%p3469_p9), [#allocation12], 4294965248 }
  0xd0   : > { %2917 = dma.done.wait (%p3470_p4), [#allocation15], 2048   ;;  %p3471_p10 = pmov %p3464_p0 }
  0xd1   : > { %v3247_v0 = vld [vmem:[#allocation5] sm:$0xf]  ;;  %v3249_v1 = vld [vmem:[#allocation5 + $0x4] sm:$0xf]  ;;  %v3251_v2 = vld [vmem:[#allocation5 + $0x8] sm:$0xf] }
  0xd2   : > { %2919 = vsyncadd (%p3471_p10), [#allocation15], 4294965248  ;;  %v3253_v3 = vld [vmem:[#allocation5 + $0xc] sm:$0xf]  ;;  %v3255_v4 = vld [vmem:[#allocation5 + $0x10] sm:$0xf] }
  0xd3   : > { %v3257_v5 = vld [vmem:[#allocation5 + $0x14] sm:$0xf]  ;;  %v3259_v6 = vld [vmem:[#allocation5 + $0x18] sm:$0xf]  ;;  %v3261_v7 = vld [vmem:[#allocation5 + $0x1c] sm:$0xf] }
  0xd4   : > { %v3263_v8 = vld [vmem:[#allocation5 + $0x20] sm:$0xf]  ;;  %v3265_v9 = vld [vmem:[#allocation5 + $0x24] sm:$0xf]  ;;  %v3267_v10 = vld [vmem:[#allocation5 + $0x28] sm:$0xf] }
  0xd5   : > { %v3269_v11 = vld [vmem:[#allocation5 + $0x2c] sm:$0xf]  ;;  %v3271_v12 = vld [vmem:[#allocation5 + $0x30] sm:$0xf]  ;;  %v3273_v13 = vld [vmem:[#allocation5 + $0x34] sm:$0xf] }
  0xd6   : > { %v3275_v14 = vld [vmem:[#allocation5 + $0x38] sm:$0xf]  ;;  %v3277_v15 = vld [vmem:[#allocation5 + $0x3c] sm:$0xf]  ;;  %p2081_p2 = scmp.ne.s32.totalorder %s2926_s30, 0 }
  0xd7   : > { %v2618_v16 = vld [vmem:[#allocation8] sm:$0xff] (!%p2081_p2)   ;;  %v2082_v17 = vcombine.low (!%p2081_p2), %v3247_v0, %v3249_v1  ;;  %v2619_v18 = vld [vmem:[#allocation8 + $0x8] sm:$0xff] (!%p2081_p2)   ;;  %v2620_v19 = vld [vmem:[#allocation8 + $0x10] sm:$0xff] (!%p2081_p2)   ;;  %v2083_v33 = vcombine.low (!%p2081_p2), %v3251_v2, %v3253_v3  ;;  %v2084_v34 = vcombine.low (!%p2081_p2), %v3255_v4, %v3257_v5  ;;  %v2085_v37 = vcombine.low (!%p2081_p2), %v3259_v6, %v3261_v7 }
  0xd8   : > { %513 = sbr.rel (%p2081_p2) target bundleno = 728 (0x2d8), region = 88  ;;  %2249 = vmatprep.subr.bf16.mxu0 (!%p2081_p2), %v2618_v16  ;;  %v2621_v20 = vld [vmem:[#allocation8 + $0x18] sm:$0xff] (!%p2081_p2)   ;;  %v2626_v21 = vld [vmem:[#allocation13] sm:$0xff] (!%p2081_p2)   ;;  %v2628_v22 = vld [vmem:[#allocation13 + $0x8] sm:$0xff] (!%p2081_p2)   ;;  %v2086_v38 = vcombine.low (!%p2081_p2), %v3263_v8, %v3265_v9  ;;  %v2087_v41 = vcombine.low (!%p2081_p2), %v3267_v10, %v3269_v11  ;;  %v2088_v42 = vcombine.low (!%p2081_p2), %v3271_v12, %v3273_v13  ;;  %v2089_v45 = vcombine.low (!%p2081_p2), %v3275_v14, %v3277_v15 }
  0xd9   : > { %2265 = vmatprep.mubr.bf16.mxu0 (!%p2081_p2), %v2082_v17  ;;  %2250 = vmatpush3.bf16.msra.mxu0 (!%p2081_p2), %v2618_v16  ;;  %v2622_v23 = vld [vmem:[#allocation8 + $0x20] sm:$0xff] (!%p2081_p2)   ;;  %v2630_v24 = vld [vmem:[#allocation13 + $0x10] sm:$0xff] (!%p2081_p2)   ;;  %v2623_v25 = vld [vmem:[#allocation8 + $0x28] sm:$0xff] (!%p2081_p2)  }
  0xda   : > { %2251 = vmatprep.subr.bf16.mxu0 (!%p2081_p2), %v2619_v18  ;;  %2281 = vmatprep.subr.bf16.mxu1 (!%p2081_p2), %v2626_v21  ;;  %v2632_v26 = vld [vmem:[#allocation13 + $0x18] sm:$0xff] (!%p2081_p2)   ;;  %v2624_v27 = vld [vmem:[#allocation8 + $0x30] sm:$0xff] (!%p2081_p2)   ;;  %v2634_v28 = vld [vmem:[#allocation13 + $0x20] sm:$0xff] (!%p2081_p2)  }
  0xdb   : > { %2282 = vmatpush3.bf16.msra.mxu1 (!%p2081_p2), %v2626_v21  ;;  %v2625_v29 = vld [vmem:[#allocation8 + $0x38] sm:$0xff] (!%p2081_p2)   ;;  %v2636_v30 = vld [vmem:[#allocation13 + $0x28] sm:$0xff] (!%p2081_p2)   ;;  %v3282_v31 = vld [vmem:[#allocation11] sm:$0xff] (!%p2081_p2)  }
  0xdc   : > { %2283 = vmatprep.subr.bf16.mxu1 (!%p2081_p2), %v2628_v22  ;;  %v2638_v32 = vld [vmem:[#allocation13 + $0x30] sm:$0xff] (!%p2081_p2)   ;;  %v3289_v35 = vld [vmem:[#allocation11 + $0x8] sm:$0xff] (!%p2081_p2)   ;;  %v3298_v39 = vld [vmem:[#allocation11 + $0x18] sm:$0xff] (!%p2081_p2)  }
  0xdd   : > { %2252 = vmatpush3.bf16.msra.mxu0 (!%p2081_p2), %v2619_v18  ;;  %v2631_v36 = vld [vmem:[#allocation11 + $0x10] sm:$0xff] (!%p2081_p2)   ;;  %v2635_v40 = vld [vmem:[#allocation11 + $0x20] sm:$0xff] (!%p2081_p2)   ;;  %v3306_v43 = vld [vmem:[#allocation11 + $0x28] sm:$0xff] (!%p2081_p2)  }
  0xde   : > { %2253 = vmatprep.subr.bf16.mxu0 (!%p2081_p2), %v2620_v19  ;;  %v3309_v44 = vld [vmem:[#allocation11 + $0x30] sm:$0xff] (!%p2081_p2)   ;;  %v2640_v46 = vld [vmem:[#allocation13 + $0x38] sm:$0xff] (!%p2081_p2)   ;;  %v2642_v48 = vld [vmem:[#allocation10] sm:$0xff] (!%p2081_p2)  }
  0xdf   : > { %2284 = vmatpush3.bf16.msra.mxu1 %v2628_v22  ;;  %v2641_v47 = vld [vmem:[#allocation11 + $0x38] sm:$0xff]   ;;  %v2643_v49 = vld [vmem:[#allocation10 + $0x8] sm:$0xff]   ;;  %v2644_v50 = vld [vmem:[#allocation10 + $0x10] sm:$0xff]  }
  0xe0   : > { %2285 = vmatprep.subr.bf16.mxu1 %v2630_v24  ;;  %v2645_v51 = vld [vmem:[#allocation10 + $0x18] sm:$0xff]  }
  0xe1   : > { %2254 = vmatpush3.bf16.msra.mxu0 %v2620_v19 }
  0xe2   : > { %2255 = vmatprep.subr.bf16.mxu0 %v2621_v20 }
  0xe3   : > { %2286 = vmatpush3.bf16.msra.mxu1 %v2630_v24 }
  0xe4   : > { %2287 = vmatprep.subr.bf16.mxu1 %v2632_v26 }
  0xe5   : > { %2256 = vmatpush3.bf16.msra.mxu0 %v2621_v20 }
  0xe6   : > { %2257 = vmatprep.subr.bf16.mxu0 %v2622_v23 }
  0xe7   : > { %2288 = vmatpush3.bf16.msra.mxu1 %v2632_v26 }
  0xe8   : > { %2289 = vmatprep.subr.bf16.mxu1 %v2634_v28 }
  0xe9   : > { %2258 = vmatpush3.bf16.msra.mxu0 %v2622_v23 }
  0xea   : > { %2259 = vmatprep.subr.bf16.mxu0 %v2623_v25 }
  0xeb   : > { %2290 = vmatpush3.bf16.msra.mxu1 %v2634_v28  ;;  %v2646_v28 = vld [vmem:[#allocation10 + $0x20] sm:$0xff]  }
  0xec   : > { %2291 = vmatprep.subr.bf16.mxu1 %v2636_v30 }
  0xed   : > { %2260 = vmatpush3.bf16.msra.mxu0 %v2623_v25 }
  0xee   : > { %2261 = vmatprep.subr.bf16.mxu0 %v2624_v27 }
  0xef   : > { %2292 = vmatpush3.bf16.msra.mxu1 %v2636_v30  ;;  %v2648_v30 = vld [vmem:[#allocation10 + $0x30] sm:$0xff]  }
  0xf0   : > { %2293 = vmatprep.subr.bf16.mxu1 %v2638_v32 }
  0xf1   : > { %2262 = vmatpush3.bf16.msra.mxu0 %v2624_v27 }
  0xf2   : > { %2263 = vmatprep.subr.bf16.mxu0 %v2625_v29 }
  0xf3   : > { %2294 = vmatpush3.bf16.msra.mxu1 %v2638_v32 }
  0xf4   : > { %2295 = vmatprep.subr.bf16.mxu1 %v2640_v46 }
  0xf5   : > { %2264 = vmatpush3.bf16.msra.mxu0 %v2625_v29  ;;  %v2647_v29 = vld [vmem:[#allocation10 + $0x28] sm:$0xff]  }
  0xf6   : > { %2313 = vmatprep.subr.bf16.mxu0 %v3282_v31 }
  0xf7   : > { %2296 = vmatpush3.bf16.msra.mxu1 %v2640_v46 }
  0xf8   : > { %2266 = vmatmul.mubr.bf16.vlgmr.msra.gmra.mrb[0].mxu0 %v2083_v33  ;;  %2441 = vmatprep.subr.bf16.mxu1 %v3282_v31 }
  0xf9   : > { %2269 = vmatprep.mubr.bf16.mxu0 %v2084_v34  ;;  %2314 = vmatpush3.bf16.msra.mxu0 %v3282_v31 }
  0xfa   : > { %2315 = vmatprep.subr.bf16.mxu0 %v3289_v35 }
  0xfd   : > { %2316 = vmatpush3.bf16.msra.mxu0 %v3289_v35 }
  0xfe   : > { %2317 = vmatprep.subr.bf16.mxu0 %v2631_v36 }
 0x100   : > { %2270 = vmatmul.mubr.bf16.gmra.mrb[4].mxu0 %v2085_v37 }
 0x101   : > { %2273 = vmatprep.mubr.bf16.mxu0 %v2086_v38  ;;  %2318 = vmatpush3.bf16.msra.mxu0 %v2631_v36 }
 0x102   : > { %2319 = vmatprep.subr.bf16.mxu0 %v3298_v39 }
 0x105   : > { %2320 = vmatpush3.bf16.msra.mxu0 %v3298_v39 }
 0x106   : > { %2321 = vmatprep.subr.bf16.mxu0 %v2635_v40 }
 0x108   : > { %2274 = vmatmul.mubr.bf16.gmra.mrb[8].mxu0 %v2087_v41  ;;  %v3329_v41 = vld [vmem:[%s3446_s7] ss:$0 sm:$0xff] }
 0x109   : > { %2277 = vmatprep.mubr.bf16.mxu0 %v2088_v42  ;;  %2322 = vmatpush3.bf16.msra.mxu0 %v2635_v40 }
 0x10a   : > { %2323 = vmatprep.subr.bf16.mxu0 %v3306_v43 }
 0x10d   : > { %2324 = vmatpush3.bf16.msra.mxu0 %v3306_v43 }
 0x10e   : > { %2325 = vmatprep.subr.bf16.mxu0 %v3309_v44 }
 0x110   : > { %2278 = vmatmul.mubr.bf16.gmra.mrb[12].mxu0 %v2089_v45 }
 0x111   : > { %2326 = vmatpush3.bf16.msra.mxu0 %v3309_v44  ;;  %2329 = vmatprep.mubr.bf16.mxu0 %v2642_v48 }
 0x112   : > { %2327 = vmatprep.subr.bf16.mxu0 %v2641_v47 }
 0x115   : > { %2328 = vmatpush3.bf16.msra.mxu0 %v2641_v47 }
 0x118   : > { %2330 = vmatmul.mubr.bf16.vlgmr.msra.gmra.mrb[16].mxu0 %v2643_v49 }
 0x119   : > { %2333 = vmatprep.mubr.bf16.mxu0 %v2644_v50 }
 0x120   : > { %2334 = vmatmul.mubr.bf16.gmra.mrb[20].mxu0 %v2645_v51 }
 0x1cb   : > { %v2267_v52 = vpop.f32.mrb[0].mxu0 }
 0x1cc   : > { %v696_v53 = vpop.f32.mrb[1].mxu0 }
 0x1cd   : > { %v2268_v54 = vpop.f32.mrb[2].mxu0 }
 0x1ce   : > { %v811_v55 = vpack.c.bf16 %v2268_v54, %v2267_v52  ;;  %v699_v56 = vpop.f32.mrb[3].mxu0 }
 0x1cf   : > { %v810_v57 = vpack.c.bf16 %v699_v56, %v696_v53 }
 0x1d1   : > { %2297 = vmatprep.mubr.bf16.mxu1 %v810_v57 }
 0x1d2   : > { %2298 = vmatmul.mubr.bf16.vlgmr.msra.gmra.mrb[0].mxu1 %v811_v55 }
 0x1d3   : > { %2449 = vmatpush3.bf16.msra.mxu1 %v3282_v31  ;;  %v2271_v58 = vpop.f32.mrb[4].mxu0  ;;  %v2649_v31 = vld [vmem:[#allocation10 + $0x38] sm:$0xff]  }
 0x1d4   : > { %v712_v59 = vpop.f32.mrb[5].mxu0  ;;  %2442 = vmatprep.subr.bf16.mxu1 %v3289_v35 }
 0x1d5   : > { %v2272_v60 = vpop.f32.mrb[6].mxu0 }
 0x1d6   : > { %v813_v61 = vpack.c.bf16 %v2272_v60, %v2271_v58  ;;  %v715_v62 = vpop.f32.mrb[7].mxu0 }
 0x1d7   : > { %v812_v63 = vpack.c.bf16 %v715_v62, %v712_v59  ;;  %2450 = vmatpush3.bf16.msra.mxu1 %v3289_v35 }
 0x1d8   : > { %2443 = vmatprep.subr.bf16.mxu1 %v2631_v36 }
 0x1d9   : > { %2301 = vmatprep.mubr.bf16.mxu1 %v812_v63 }
 0x1da   : > { %2302 = vmatmul.mubr.bf16.gmra.mrb[4].mxu1 %v813_v61 }
 0x1db   : > { %2451 = vmatpush3.bf16.msra.mxu1 %v2631_v36  ;;  %v2275_v16 = vpop.f32.mrb[8].mxu0 }
 0x1dc   : > { %v728_v17 = vpop.f32.mrb[9].mxu0  ;;  %2444 = vmatprep.subr.bf16.mxu1 %v3298_v39 }
 0x1dd   : > { %v2276_v18 = vpop.f32.mrb[10].mxu0 }
 0x1de   : > { %v815_v19 = vpack.c.bf16 %v2276_v18, %v2275_v16  ;;  %v731_v20 = vpop.f32.mrb[11].mxu0 }
 0x1df   : > { %v814_v21 = vpack.c.bf16 %v731_v20, %v728_v17  ;;  %2452 = vmatpush3.bf16.msra.mxu1 %v3298_v39 }
 0x1e0   : > { %2445 = vmatprep.subr.bf16.mxu1 %v2635_v40 }
 0x1e1   : > { %2305 = vmatprep.mubr.bf16.mxu1 %v814_v21 }
 0x1e2   : > { %2306 = vmatmul.mubr.bf16.gmra.mrb[8].mxu1 %v815_v19 }
 0x1e3   : > { %2453 = vmatpush3.bf16.msra.mxu1 %v2635_v40  ;;  %v2279_v22 = vpop.f32.mrb[12].mxu0 }
 0x1e4   : > { %v744_v23 = vpop.f32.mrb[13].mxu0  ;;  %2446 = vmatprep.subr.bf16.mxu1 %v3306_v43 }
 0x1e5   : > { %v2280_v24 = vpop.f32.mrb[14].mxu0 }
 0x1e6   : > { %v817_v25 = vpack.c.bf16 %v2280_v24, %v2279_v22  ;;  %v747_v26 = vpop.f32.mrb[15].mxu0 }
 0x1e7   : > { %v816_v27 = vpack.c.bf16 %v747_v26, %v744_v23  ;;  %2454 = vmatpush3.bf16.msra.mxu1 %v3306_v43 }
 0x1e8   : > { %2447 = vmatprep.subr.bf16.mxu1 %v3309_v44 }
 0x1e9   : > { %2309 = vmatprep.mubr.bf16.mxu1 %v816_v27 }
 0x1ea   : > { %2310 = vmatmul.mubr.bf16.gmra.mrb[12].mxu1 %v817_v25 }
 0x1eb   : > { %2455 = vmatpush3.bf16.msra.mxu1 %v3309_v44  ;;  %2337 = vmatprep.mubr.bf16.mxu1 %v2646_v28  ;;  %v2331_v32 = vpop.f32.mrb[16].mxu0 }
 0x1ec   : > { %2448 = vmatprep.subr.bf16.mxu1 %v2641_v47  ;;  %v1141_v33 = vpop.f32.mrb[17].mxu0 }
 0x1ed   : > { %v2332_v34 = vpop.f32.mrb[18].mxu0 }
 0x1ee   : > { %v1144_v35 = vpop.f32.mrb[19].mxu0 }
 0x1ef   : > { %2456 = vmatpush3.bf16.msra.mxu1 %v2641_v47 }
 0x1f2   : > { %2338 = vmatmul.mubr.bf16.vlgmr.msra.gmra.mrb[8].mxu1 %v2647_v29 }
 0x1f3   : > { %2341 = vmatprep.mubr.bf16.mxu1 %v2648_v30  ;;  %v2335_v36 = vpop.f32.mrb[20].mxu0 }
 0x1f4   : > { %v1157_v37 = vpop.f32.mrb[21].mxu0 }
 0x1f5   : > { %v2336_v38 = vpop.f32.mrb[22].mxu0 }
 0x1f6   : > { %v1160_v39 = vpop.f32.mrb[23].mxu0 }
 0x1fa   : > { %2342 = vmatmul.mubr.bf16.gmra.mrb[12].mxu1 %v2649_v31 }
 0x2a5   : > { %v2299_v40 = vpop.f32.mrb[0].mxu1 }
 0x2a6   : > { %v1150_v42 = vadd.f32 %v2331_v32, %v2299_v40  ;;  %v948_v43 = vpop.f32.mrb[1].mxu1 }
 0x2a7   : > { %v1142_v44 = vadd.f32 %v1141_v33, %v948_v43  ;;  %v2300_v45 = vpop.f32.mrb[2].mxu1 }
 0x2a8   : > { %v1213_v46 = vadd.f32 %v3329_v41, %v1150_v42  ;;  %v1153_v47 = vadd.f32 %v2332_v34, %v2300_v45  ;;  %v951_v48 = vpop.f32.mrb[3].mxu1 }
 0x2a9   : > { %v1211_v49 = vadd.f32 %v3329_v41, %v1142_v44  ;;  %v1145_v50 = vadd.f32 %v1144_v35, %v951_v48 }
 0x2aa   : > { %v1214_v51 = vadd.f32 %v3329_v41, %v1153_v47  ;;  %v1229_v53 = vmax.f32 %v1213_v46, 0.0 }
 0x2ab   : > { %v1212_v52 = vadd.f32 %v3329_v41, %v1145_v50  ;;  %v1227_v55 = vmax.f32 %v1211_v49, 0.0 }
 0x2ac   : > { %v1230_v54 = vmax.f32 %v1214_v51, 0.0 }
 0x2ad   : > { %v1228_v56 = vmax.f32 %v1212_v52, 0.0  ;;  %v2303_v57 = vpop.f32.mrb[4].mxu1 }
 0x2ae   : > { %v1244_v58 = vpack.c.bf16 %v1230_v54, %v1229_v53  ;;  %v1166_v59 = vadd.f32 %v2335_v36, %v2303_v57  ;;  %v964_v60 = vpop.f32.mrb[5].mxu1 }
 0x2af   : > { %v1243_v61 = vpack.c.bf16 %v1228_v56, %v1227_v55  ;;  %v1158_v62 = vadd.f32 %v1157_v37, %v964_v60  ;;  %v2304_v63 = vpop.f32.mrb[6].mxu1 }
 0x2b0   : > { %1256 = vst [vmem:[#allocation2 + $0x8] sm:$0xff] %v1244_v58  ;;  %v1217_v16 = vadd.f32 %v3329_v41, %v1166_v59  ;;  %v1169_v17 = vadd.f32 %v2336_v38, %v2304_v63  ;;  %v967_v18 = vpop.f32.mrb[7].mxu1 }
 0x2b1   : > { %1255 = vst [vmem:[#allocation2] sm:$0xff] %v1243_v61  ;;  %v1215_v19 = vadd.f32 %v3329_v41, %v1158_v62  ;;  %v1161_v20 = vadd.f32 %v1160_v39, %v967_v18 }
 0x2b2   : > { %v1218_v21 = vadd.f32 %v3329_v41, %v1169_v17  ;;  %v1233_v23 = vmax.f32 %v1217_v16, 0.0 }
 0x2b3   : > { %v1216_v22 = vadd.f32 %v3329_v41, %v1161_v20  ;;  %v1231_v25 = vmax.f32 %v1215_v19, 0.0 }
 0x2b4   : > { %v1234_v24 = vmax.f32 %v1218_v21, 0.0 }
 0x2b5   : > { %v1232_v26 = vmax.f32 %v1216_v22, 0.0 }
 0x2b6   : > { %v1246_v27 = vpack.c.bf16 %v1234_v24, %v1233_v23 }
 0x2b7   : > { %v1245_v28 = vpack.c.bf16 %v1232_v26, %v1231_v25 }
 0x2b8   : > { %1258 = vst [vmem:[#allocation2 + $0x18] sm:$0xff] %v1246_v27 }
 0x2b9   : > { %1257 = vst [vmem:[#allocation2 + $0x10] sm:$0xff] %v1245_v28 }
 0x2c5   : > { %v2339_v29 = vpop.f32.mrb[8].mxu1 }
 0x2c6   : > { %v1221_v30 = vadd.f32 %v2339_v29, %v3329_v41  ;;  %v1173_v31 = vpop.f32.mrb[9].mxu1 }
 0x2c7   : > { %v1219_v32 = vadd.f32 %v3329_v41, %v1173_v31  ;;  %v2340_v33 = vpop.f32.mrb[10].mxu1 }
 0x2c8   : > { %v1222_v34 = vadd.f32 %v2340_v33, %v3329_v41  ;;  %v1176_v35 = vpop.f32.mrb[11].mxu1  ;;  %v1237_v37 = vmax.f32 %v1221_v30, 0.0 }
 0x2c9   : > { %v1220_v36 = vadd.f32 %v3329_v41, %v1176_v35  ;;  %v1235_v39 = vmax.f32 %v1219_v32, 0.0 }
 0x2ca   : > { %v1238_v38 = vmax.f32 %v1222_v34, 0.0 }
 0x2cb   : > { %v1236_v40 = vmax.f32 %v1220_v36, 0.0 }
 0x2cc   : > { %v1248_v42 = vpack.c.bf16 %v1238_v38, %v1237_v37 }
 0x2cd   : > { %v1247_v43 = vpack.c.bf16 %v1236_v40, %v1235_v39  ;;  %v2343_v44 = vpop.f32.mrb[12].mxu1 }
 0x2ce   : > { %1260 = vst [vmem:[#allocation2 + $0x28] sm:$0xff] %v1248_v42  ;;  %v1225_v45 = vadd.f32 %v2343_v44, %v3329_v41  ;;  %v1189_v46 = vpop.f32.mrb[13].mxu1 }
 0x2cf   : > { %1259 = vst [vmem:[#allocation2 + $0x20] sm:$0xff] %v1247_v43  ;;  %v1223_v47 = vadd.f32 %v3329_v41, %v1189_v46  ;;  %v2344_v48 = vpop.f32.mrb[14].mxu1 }
 0x2d0   : > { %v1226_v49 = vadd.f32 %v2344_v48, %v3329_v41  ;;  %v1192_v50 = vpop.f32.mrb[15].mxu1  ;;  %v1241_v52 = vmax.f32 %v1225_v45, 0.0 }
 0x2d1   : > { %v1224_v51 = vadd.f32 %v3329_v41, %v1192_v50  ;;  %v1239_v54 = vmax.f32 %v1223_v47, 0.0 }
 0x2d2   : > { %v1242_v53 = vmax.f32 %v1226_v49, 0.0 }
 0x2d3   : > { %v1240_v55 = vmax.f32 %v1224_v51, 0.0 }
 0x2d4   : > { %v1250_v56 = vpack.c.bf16 %v1242_v53, %v1241_v52 }
 0x2d5   : > { %v1249_v57 = vpack.c.bf16 %v1240_v55, %v1239_v54 }
 0x2d6   : > { %1262 = vst [vmem:[#allocation2 + $0x38] sm:$0xff] %v1250_v56 }
 0x2d7   : > { %1261 = vst [vmem:[#allocation2 + $0x30] sm:$0xff] %v1249_v57 }
 0x2d8 PF: > { %p2123_p8 = scmp.ne.s32.totalorder %s2926_s30, 1 }
 0x2d9   : > { %v3348_v58 = vld [vmem:[#allocation2] sm:$0xff] (!%p2123_p8)  ;;  %v3350_v59 = vld [vmem:[#allocation2 + $0x8] sm:$0xff] (!%p2123_p8)  ;;  %v2124_v60 = vcombine.low (!%p2123_p8), %v3247_v0, %v3249_v1  ;;  %v3357_v61 = vld [vmem:[#allocation2 + $0x10] sm:$0xff] (!%p2123_p8)  ;;  %v2125_v24 = vcombine.low (!%p2123_p8), %v3251_v2, %v3253_v3  ;;  %v2126_v25 = vcombine.low (!%p2123_p8), %v3255_v4, %v3257_v5  ;;  %v2127_v28 = vcombine.low (!%p2123_p8), %v3259_v6, %v3261_v7 }
 0x2da   : > { %1266 = sbr.rel (%p2123_p8) target bundleno = 1238 (0x4d6), region = 100  ;;  %2345 = vmatprep.subr.bf16.mxu0 (!%p2123_p8), %v3348_v58  ;;  %v2650_v41 = vld [vmem:[#allocation16] sm:$0xff] (!%p2123_p8)   ;;  %v2652_v62 = vld [vmem:[#allocation16 + $0x8] sm:$0xff] (!%p2123_p8)   ;;  %v2654_v63 = vld [vmem:[#allocation16 + $0x10] sm:$0xff] (!%p2123_p8)   ;;  %v2128_v29 = vcombine.low (!%p2123_p8), %v3263_v8, %v3265_v9  ;;  %v2129_v4 = vcombine.low (!%p2123_p8), %v3267_v10, %v3269_v11  ;;  %v2130_v5 = vcombine.low (!%p2123_p8), %v3271_v12, %v3273_v13  ;;  %v2131_v8 = vcombine.low (!%p2123_p8), %v3275_v14, %v3277_v15 }
 0x2db   : > { %2346 = vmatpush3.bf16.msra.mxu0 (!%p2123_p8), %v3348_v58  ;;  %2361 = vmatprep.mubr.bf16.mxu0 (!%p2123_p8), %v2124_v60  ;;  %v3361_v0 = vld [vmem:[#allocation2 + $0x18] sm:$0xff] (!%p2123_p8)  ;;  %v3365_v16 = vld [vmem:[#allocation2 + $0x20] sm:$0xff] (!%p2123_p8)  ;;  %v3369_v18 = vld [vmem:[#allocation2 + $0x28] sm:$0xff] (!%p2123_p8) }
 0x2dc   : > { %2347 = vmatprep.subr.bf16.mxu0 (!%p2123_p8), %v3350_v59  ;;  %2377 = vmatprep.subr.bf16.mxu1 (!%p2123_p8), %v2650_v41  ;;  %v2656_v1 = vld [vmem:[#allocation16 + $0x18] sm:$0xff] (!%p2123_p8)   ;;  %v2658_v17 = vld [vmem:[#allocation16 + $0x20] sm:$0xff] (!%p2123_p8)   ;;  %v2660_v19 = vld [vmem:[#allocation16 + $0x28] sm:$0xff] (!%p2123_p8)  }
 0x2dd   : > { %2378 = vmatpush3.bf16.msra.mxu1 (!%p2123_p8), %v2650_v41  ;;  %v2662_v21 = vld [vmem:[#allocation16 + $0x30] sm:$0xff] (!%p2123_p8)   ;;  %v3377_v22 = vld [vmem:[#allocation2 + $0x38] sm:$0xff] (!%p2123_p8)  ;;  %v2651_v23 = vld [vmem:[#allocation14] sm:$0xff] (!%p2123_p8)  }
 0x2de   : > { %2379 = vmatprep.subr.bf16.mxu1 (!%p2123_p8), %v2652_v62  ;;  %v3373_v20 = vld [vmem:[#allocation2 + $0x30] sm:$0xff] (!%p2123_p8)  ;;  %v2653_v26 = vld [vmem:[#allocation14 + $0x8] sm:$0xff] (!%p2123_p8)   ;;  %v2657_v2 = vld [vmem:[#allocation14 + $0x18] sm:$0xff] (!%p2123_p8)  }
 0x2df   : > { %2348 = vmatpush3.bf16.msra.mxu0 (!%p2123_p8), %v3350_v59  ;;  %v2655_v27 = vld [vmem:[#allocation14 + $0x10] sm:$0xff] (!%p2123_p8)   ;;  %v2659_v3 = vld [vmem:[#allocation14 + $0x20] sm:$0xff] (!%p2123_p8)   ;;  %v2661_v6 = vld [vmem:[#allocation14 + $0x28] sm:$0xff] (!%p2123_p8)  }
 0x2e0   : > { %2349 = vmatprep.subr.bf16.mxu0 (!%p2123_p8), %v3357_v61  ;;  %v2663_v7 = vld [vmem:[#allocation14 + $0x30] sm:$0xff] (!%p2123_p8)   ;;  %v2664_v9 = vld [vmem:[#allocation16 + $0x38] sm:$0xff] (!%p2123_p8)  }
 0x2e1   : > { %2380 = vmatpush3.bf16.msra.mxu1 %v2652_v62  ;;  %v2665_v10 = vld [vmem:[#allocation14 + $0x38] sm:$0xff]  }
 0x2e2   : > { %2381 = vmatprep.subr.bf16.mxu1 %v2654_v63 }
 0x2e3   : > { %2350 = vmatpush3.bf16.msra.mxu0 %v3357_v61 }
 0x2e4   : > { %2351 = vmatprep.subr.bf16.mxu0 %v3361_v0 }
 0x2e5   : > { %2382 = vmatpush3.bf16.msra.mxu1 %v2654_v63 }
 0x2e6   : > { %2383 = vmatprep.subr.bf16.mxu1 %v2656_v1 }
 0x2e7   : > { %2352 = vmatpush3.bf16.msra.mxu0 %v3361_v0 }
 0x2e8   : > { %2353 = vmatprep.subr.bf16.mxu0 %v3365_v16 }
 0x2e9   : > { %2384 = vmatpush3.bf16.msra.mxu1 %v2656_v1 }
 0x2ea   : > { %2385 = vmatprep.subr.bf16.mxu1 %v2658_v17 }
 0x2eb   : > { %2354 = vmatpush3.bf16.msra.mxu0 %v3365_v16 }
 0x2ec   : > { %2355 = vmatprep.subr.bf16.mxu0 %v3369_v18 }
 0x2ed   : > { %2386 = vmatpush3.bf16.msra.mxu1 %v2658_v17 }
 0x2ee   : > { %2387 = vmatprep.subr.bf16.mxu1 %v2660_v19 }
 0x2ef   : > { %2356 = vmatpush3.bf16.msra.mxu0 %v3369_v18 }
 0x2f0   : > { %2357 = vmatprep.subr.bf16.mxu0 %v3373_v20 }
 0x2f1   : > { %2388 = vmatpush3.bf16.msra.mxu1 %v2660_v19 }
 0x2f2   : > { %2389 = vmatprep.subr.bf16.mxu1 %v2662_v21 }
 0x2f3   : > { %2358 = vmatpush3.bf16.msra.mxu0 %v3373_v20 }
 0x2f4   : > { %2359 = vmatprep.subr.bf16.mxu0 %v3377_v22 }
 0x2f5   : > { %2390 = vmatpush3.bf16.msra.mxu1 %v2662_v21 }
 0x2f6   : > { %2391 = vmatprep.subr.bf16.mxu1 %v2664_v9 }
 0x2f7   : > { %2360 = vmatpush3.bf16.msra.mxu0 %v3377_v22 }
 0x2f8   : > { %2409 = vmatprep.subr.bf16.mxu0 %v2651_v23 }
 0x2f9   : > { %2392 = vmatpush3.bf16.msra.mxu1 %v2664_v9 }
 0x2fa   : > { %2362 = vmatmul.mubr.bf16.vlgmr.msra.gmra.mrb[0].mxu0 %v2125_v24  ;;  %2473 = vmatprep.subr.bf16.mxu1 %v2651_v23 }
 0x2fb   : > { %2365 = vmatprep.mubr.bf16.mxu0 %v2126_v25  ;;  %2410 = vmatpush3.bf16.msra.mxu0 %v2651_v23 }
 0x2fc   : > { %2411 = vmatprep.subr.bf16.mxu0 %v2653_v26 }
 0x2ff   : > { %2412 = vmatpush3.bf16.msra.mxu0 %v2653_v26 }
 0x300   : > { %2413 = vmatprep.subr.bf16.mxu0 %v2655_v27 }
 0x302   : > { %2366 = vmatmul.mubr.bf16.gmra.mrb[4].mxu0 %v2127_v28 }
 0x303   : > { %2369 = vmatprep.mubr.bf16.mxu0 %v2128_v29  ;;  %2414 = vmatpush3.bf16.msra.mxu0 %v2655_v27 }
 0x304   : > { %2415 = vmatprep.subr.bf16.mxu0 %v2657_v2 }
 0x307   : > { %2416 = vmatpush3.bf16.msra.mxu0 %v2657_v2 }
 0x308   : > { %2417 = vmatprep.subr.bf16.mxu0 %v2659_v3 }
 0x30a   : > { %2370 = vmatmul.mubr.bf16.gmra.mrb[8].mxu0 %v2129_v4 }
 0x30b   : > { %2373 = vmatprep.mubr.bf16.mxu0 %v2130_v5  ;;  %2418 = vmatpush3.bf16.msra.mxu0 %v2659_v3 }
 0x30c   : > { %2419 = vmatprep.subr.bf16.mxu0 %v2661_v6 }
 0x30f   : > { %2420 = vmatpush3.bf16.msra.mxu0 %v2661_v6 }
 0x310   : > { %2421 = vmatprep.subr.bf16.mxu0 %v2663_v7 }
 0x312   : > { %2374 = vmatmul.mubr.bf16.gmra.mrb[12].mxu0 %v2131_v8 }
 0x313   : > { %2422 = vmatpush3.bf16.msra.mxu0 %v2663_v7  ;;  %2425 = vmatprep.mubr.bf16.mxu0 %v3348_v58 }
 0x314   : > { %2423 = vmatprep.subr.bf16.mxu0 %v2665_v10 }
 0x317   : > { %2424 = vmatpush3.bf16.msra.mxu0 %v2665_v10 }
 0x31a   : > { %2426 = vmatmul.mubr.bf16.vlgmr.msra.gmra.mrb[16].mxu0 %v3350_v59  ;;  %v2148_v59 = vld [vmem:[%s3447_s8] ss:$0 sm:$0xff] }
 0x31b   : > { %2429 = vmatprep.mubr.bf16.mxu0 %v3357_v61 }
 0x322   : > { %2430 = vmatmul.mubr.bf16.gmra.mrb[20].mxu0 %v3361_v0 }
 0x3cd   : > { %v2363_v11 = vpop.f32.mrb[0].mxu0 }
 0x3ce   : > { %v1397_v12 = vpop.f32.mrb[1].mxu0 }
 0x3cf   : > { %v2364_v13 = vpop.f32.mrb[2].mxu0 }
 0x3d0   : > { %v1512_v14 = vpack.c.bf16 %v2364_v13, %v2363_v11  ;;  %v1400_v15 = vpop.f32.mrb[3].mxu0 }
 0x3d1   : > { %v1511_v30 = vpack.c.bf16 %v1400_v15, %v1397_v12 }
 0x3d3   : > { %2393 = vmatprep.mubr.bf16.mxu1 %v1511_v30 }
 0x3d4   : > { %2394 = vmatmul.mubr.bf16.vlgmr.msra.gmra.mrb[0].mxu1 %v1512_v14 }
 0x3d5   : > { %2481 = vmatpush3.bf16.msra.mxu1 %v2651_v23  ;;  %v2367_v31 = vpop.f32.mrb[4].mxu0 }
 0x3d6   : > { %v1413_v32 = vpop.f32.mrb[5].mxu0  ;;  %2474 = vmatprep.subr.bf16.mxu1 %v2653_v26 }
 0x3d7   : > { %v2368_v33 = vpop.f32.mrb[6].mxu0 }
 0x3d8   : > { %v1514_v34 = vpack.c.bf16 %v2368_v33, %v2367_v31  ;;  %v1416_v35 = vpop.f32.mrb[7].mxu0 }
 0x3d9   : > { %v1513_v36 = vpack.c.bf16 %v1416_v35, %v1413_v32  ;;  %2482 = vmatpush3.bf16.msra.mxu1 %v2653_v26 }
 0x3da   : > { %2475 = vmatprep.subr.bf16.mxu1 %v2655_v27 }
 0x3db   : > { %2397 = vmatprep.mubr.bf16.mxu1 %v1513_v36 }
 0x3dc   : > { %2398 = vmatmul.mubr.bf16.gmra.mrb[4].mxu1 %v1514_v34 }
 0x3dd   : > { %2483 = vmatpush3.bf16.msra.mxu1 %v2655_v27  ;;  %v2371_v37 = vpop.f32.mrb[8].mxu0 }
 0x3de   : > { %v1429_v38 = vpop.f32.mrb[9].mxu0  ;;  %2476 = vmatprep.subr.bf16.mxu1 %v2657_v2 }
 0x3df   : > { %v2372_v39 = vpop.f32.mrb[10].mxu0 }
 0x3e0   : > { %v1516_v40 = vpack.c.bf16 %v2372_v39, %v2371_v37  ;;  %v1432_v42 = vpop.f32.mrb[11].mxu0 }
 0x3e1   : > { %v1515_v43 = vpack.c.bf16 %v1432_v42, %v1429_v38  ;;  %2484 = vmatpush3.bf16.msra.mxu1 %v2657_v2 }
 0x3e2   : > { %2477 = vmatprep.subr.bf16.mxu1 %v2659_v3 }
 0x3e3   : > { %2401 = vmatprep.mubr.bf16.mxu1 %v1515_v43 }
 0x3e4   : > { %2402 = vmatmul.mubr.bf16.gmra.mrb[8].mxu1 %v1516_v40 }
 0x3e5   : > { %2485 = vmatpush3.bf16.msra.mxu1 %v2659_v3  ;;  %v2375_v44 = vpop.f32.mrb[12].mxu0 }
 0x3e6   : > { %v1445_v45 = vpop.f32.mrb[13].mxu0  ;;  %2478 = vmatprep.subr.bf16.mxu1 %v2661_v6 }
 0x3e7   : > { %v2376_v46 = vpop.f32.mrb[14].mxu0 }
 0x3e8   : > { %v1518_v47 = vpack.c.bf16 %v2376_v46, %v2375_v44  ;;  %v1448_v48 = vpop.f32.mrb[15].mxu0 }
 0x3e9   : > { %v1517_v49 = vpack.c.bf16 %v1448_v48, %v1445_v45  ;;  %2486 = vmatpush3.bf16.msra.mxu1 %v2661_v6 }
 0x3ea   : > { %2479 = vmatprep.subr.bf16.mxu1 %v2663_v7 }
 0x3eb   : > { %2405 = vmatprep.mubr.bf16.mxu1 %v1517_v49 }
 0x3ec   : > { %2406 = vmatmul.mubr.bf16.gmra.mrb[12].mxu1 %v1518_v47 }
 0x3ed   : > { %2487 = vmatpush3.bf16.msra.mxu1 %v2663_v7  ;;  %2433 = vmatprep.mubr.bf16.mxu1 %v3365_v16  ;;  %v2427_v50 = vpop.f32.mrb[16].mxu0 }
 0x3ee   : > { %2480 = vmatprep.subr.bf16.mxu1 %v2665_v10  ;;  %v1790_v51 = vpop.f32.mrb[17].mxu0 }
 0x3ef   : > { %v2428_v52 = vpop.f32.mrb[18].mxu0 }
 0x3f0   : > { %v1793_v53 = vpop.f32.mrb[19].mxu0 }
 0x3f1   : > { %2488 = vmatpush3.bf16.msra.mxu1 %v2665_v10 }
 0x3f4   : > { %2434 = vmatmul.mubr.bf16.vlgmr.msra.gmra.mrb[8].mxu1 %v3369_v18 }
 0x3f5   : > { %2437 = vmatprep.mubr.bf16.mxu1 %v3373_v20  ;;  %v2431_v54 = vpop.f32.mrb[20].mxu0 }
 0x3f6   : > { %v1806_v55 = vpop.f32.mrb[21].mxu0 }
 0x3f7   : > { %v2432_v56 = vpop.f32.mrb[22].mxu0 }
 0x3f8   : > { %v1809_v57 = vpop.f32.mrb[23].mxu0 }
 0x3fc   : > { %2438 = vmatmul.mubr.bf16.gmra.mrb[12].mxu1 %v3377_v22 }
 0x4a7   : > { %v2395_v58 = vpop.f32.mrb[0].mxu1 }
 0x4a8   : > { %v1799_v60 = vadd.f32 %v2427_v50, %v2395_v58  ;;  %v1645_v41 = vpop.f32.mrb[1].mxu1 }
 0x4a9   : > { %v1791_v61 = vadd.f32 %v1790_v51, %v1645_v41  ;;  %v2396_v62 = vpop.f32.mrb[2].mxu1 }
 0x4aa   : > { %v1862_v63 = vadd.f32 %v2148_v59, %v1799_v60  ;;  %v1802_v0 = vadd.f32 %v2428_v52, %v2396_v62  ;;  %v1648_v1 = vpop.f32.mrb[3].mxu1 }
 0x4ab   : > { %v1860_v16 = vadd.f32 %v2148_v59, %v1791_v61  ;;  %v1794_v17 = vadd.f32 %v1793_v53, %v1648_v1 }
 0x4ac   : > { %1878 = vst [vmem:[#allocation17 + $0x10] sm:$0xff] %v1862_v63  ;;  %v1863_v18 = vadd.f32 %v2148_v59, %v1802_v0 }
 0x4ad   : > { %1876 = vst [vmem:[#allocation17] sm:$0xff] %v1860_v16  ;;  %v1861_v19 = vadd.f32 %v2148_v59, %v1794_v17 }
 0x4ae   : > { %1879 = vst [vmem:[#allocation17 + $0x18] sm:$0xff] %v1863_v18 }
 0x4af   : > { %1877 = vst [vmem:[#allocation17 + $0x8] sm:$0xff] %v1861_v19  ;;  %v2399_v20 = vpop.f32.mrb[4].mxu1 }
 0x4b0   : > { %v1815_v21 = vadd.f32 %v2431_v54, %v2399_v20  ;;  %v1661_v22 = vpop.f32.mrb[5].mxu1 }
 0x4b1   : > { %v1807_v23 = vadd.f32 %v1806_v55, %v1661_v22  ;;  %v2400_v24 = vpop.f32.mrb[6].mxu1 }
 0x4b2   : > { %v1866_v25 = vadd.f32 %v2148_v59, %v1815_v21  ;;  %v1818_v26 = vadd.f32 %v2432_v56, %v2400_v24  ;;  %v1664_v27 = vpop.f32.mrb[7].mxu1 }
 0x4b3   : > { %v1864_v28 = vadd.f32 %v2148_v59, %v1807_v23  ;;  %v1810_v29 = vadd.f32 %v1809_v57, %v1664_v27 }
 0x4b4   : > { %1882 = vst [vmem:[#allocation17 + $0x30] sm:$0xff] %v1866_v25  ;;  %v1867_v2 = vadd.f32 %v2148_v59, %v1818_v26 }
 0x4b5   : > { %1880 = vst [vmem:[#allocation17 + $0x20] sm:$0xff] %v1864_v28  ;;  %v1865_v3 = vadd.f32 %v2148_v59, %v1810_v29 }
 0x4b6   : > { %1883 = vst [vmem:[#allocation17 + $0x38] sm:$0xff] %v1867_v2 }
 0x4b7   : > { %1881 = vst [vmem:[#allocation17 + $0x28] sm:$0xff] %v1865_v3 }
 0x4c7   : > { %v2435_v4 = vpop.f32.mrb[8].mxu1 }
 0x4c8   : > { %v1870_v5 = vadd.f32 %v2435_v4, %v2148_v59  ;;  %v1822_v6 = vpop.f32.mrb[9].mxu1 }
 0x4c9   : > { %v1868_v7 = vadd.f32 %v2148_v59, %v1822_v6  ;;  %v2436_v8 = vpop.f32.mrb[10].mxu1 }
 0x4ca   : > { %1886 = vst [vmem:[#allocation17 + $0x50] sm:$0xff] %v1870_v5  ;;  %v1871_v9 = vadd.f32 %v2436_v8, %v2148_v59  ;;  %v1825_v10 = vpop.f32.mrb[11].mxu1 }
 0x4cb   : > { %1884 = vst [vmem:[#allocation17 + $0x40] sm:$0xff] %v1868_v7  ;;  %v1869_v11 = vadd.f32 %v2148_v59, %v1825_v10 }
 0x4cc   : > { %1887 = vst [vmem:[#allocation17 + $0x58] sm:$0xff] %v1871_v9 }
 0x4cd   : > { %1885 = vst [vmem:[#allocation17 + $0x48] sm:$0xff] %v1869_v11 }
 0x4cf   : > { %v2439_v12 = vpop.f32.mrb[12].mxu1 }
 0x4d0   : > { %v1874_v13 = vadd.f32 %v2439_v12, %v2148_v59  ;;  %v1838_v14 = vpop.f32.mrb[13].mxu1 }
 0x4d1   : > { %v1872_v15 = vadd.f32 %v2148_v59, %v1838_v14  ;;  %v2440_v30 = vpop.f32.mrb[14].mxu1 }
 0x4d2   : > { %1890 = vst [vmem:[#allocation17 + $0x70] sm:$0xff] %v1874_v13  ;;  %v1875_v31 = vadd.f32 %v2440_v30, %v2148_v59  ;;  %v1841_v32 = vpop.f32.mrb[15].mxu1 }
 0x4d3   : > { %1888 = vst [vmem:[#allocation17 + $0x60] sm:$0xff] %v1872_v15  ;;  %v1873_v33 = vadd.f32 %v2148_v59, %v1841_v32 }
 0x4d4   : > { %1891 = vst [vmem:[#allocation17 + $0x78] sm:$0xff] %v1875_v31 }
 0x4d5   : > { %1889 = vst [vmem:[#allocation17 + $0x68] sm:$0xff] %v1873_v33 }
 0x4d6 PF: > { %p2579_p11 = scmp.eq.s32.totalorder %s3014_s12, 1  ;;  %s2945_s3 = smov [#allocation17]  }
 0x4d7   : > { %s1907_s17 = sshll.u32 %s2945_s3, 4  ;;  %s1908_s17 = int_to_ptr.vmem [resolvable:$true] %s1907_s17 }
 0x4d8   : > { %s2862_s28 = scalar_lea.vmem %s1908_s17, 2048  ;;  %s2868_s15 = scalar_lea.vmem %s1908_s17, 4096 }
 0x4d9   : > { %p2863_p6 = scmp.ne.s32.totalorder %s1908_s17, %s2862_s28  ;;  %p2869_p0 = scmp.lt.s32.totalorder %s1908_s17, %s1908_s17 }
 0x4da   : > { %p2870_p1 = scmp.lt.s32.totalorder %s2868_s15, %s2862_s28 }
 0x4db   : > { %p2864_p12 = pnand %p2863_p6, %p2579_p11 }
 0x4dc   : > { %p2871_p3 = por %p2870_p1, %p2869_p0 }
 0x4dd   : > { %p2865_p13 = pneg %p2864_p12 }
 0x4df   : > { %p2872_p5 = pnand %p2871_p3, %p2865_p13 }
 0x4e1   : > { %2875 = shalt.err (!%p2872_p5)
}
 0x4e2   : > { %s2876_s13 = scalar_lea.hbm %s3448_s9, 2048 }
 0x4e3   : > { %p2877_p7 = scmp.ne.s32.totalorder %s3448_s9, %s2876_s13  ;;  %p2882_p10 = scmp.lt.u32.totalorder %s2876_s13, %s3448_s9 }
 0x4e5   : > { %p2878_p9 = pnand %p2877_p7, %p2579_p11 }
 0x4e7   : > { %p2879_p4 = pneg %p2878_p9 }
 0x4e9   : > { %p2884_p2 = pnand %p2882_p10, %p2879_p4 }
 0x4eb   : > { %2887 = shalt.err (!%p2884_p2)
}
 0x4ec   : > { %s2946_s23 = smov 128   ;;  %s2947_s27 = smov 8  }
 0x4ed   : > { %2534 = dma.vmem_to_hbm [thread:$0]  (%p2579_p11), %s1908_s17, 2048, %s3448_s9, [#allocation7], %s2946_s23, %s2946_s23, %s2947_s27  }
 0x4ee PF: > { %s3472_s14 = sadd.s32 4294967294, %s2934_s11   ;;  %p3473_p6 = scmp.ge.s32.totalorder %s2934_s11, 2 }
 0x4ef   : > { %p2581_p8 = scmp.eq.s32.totalorder %s3472_s14, 1 }
 0x4f1   : > { %p2561_p12 = pnand %p2581_p8, %p3473_p6 }
 0x4f3   : > { %2921 = dma.done.wait (!%p2561_p12), [#allocation7], 2048  }
 0x4f4   : > { %2923 = vsyncadd (!%p2561_p12), [#allocation7], 4294965248  ;;  %s28_s11 = sadd.s32 1, %s2934_s11   ;;  %s3474_s30 = smov %s2930_s10 }
 0x4f5   : > { %p25_p13 = scmp.ge.s32.totalorder %s28_s11, 4   ;;  %s3475_s10 = smov %s3477_s22 }
 0x4f7   :  { %27 = sbr.rel (!%p25_p13) target bundleno = 11 (0xb), region = 155 }
 0x4fe   :  { %1928 = vsyncpa [#allocation6], 1 }
 0x4ff   :  { %1930 = vsyncpa [#allocation6 + $0x1], 1 }
 0x500   :  { %1931 = vsyncpa [#allocation9], 1 }
 0x501   :  { %1933 = vsyncpa [#allocation9 + $0x1], 1 }
 0x502   :  { %1934 = vsyncpa [#allocation12], 1 }
 0x503   :  { %1935 = vsyncpa [#allocation15], 1 }
 0x504   :  { %1936 = vsyncpa [#allocation7], 1 }
 0x505   :  { %1938 = vsyncpa [#allocation7 + $0x1], 1 }

</bundles_post_ra>
